<compile_context>
chip_gen: v7x
topology: tpu7x:2x2x1
jax: 0.10.0
libtpu: 0.0.40
codegen_flags: <defaults>
</compile_context>

<pallas_src>
import jax
import jax.numpy as jnp
import numpy as np
from jax import lax
from jax.experimental import pallas as pl
from jax.experimental.pallas import tpu as pltpu

DN_OUTPUT_SIZE = 64            # policy logits
HEAD_WIDTH = 128               # lane-dense head width: [0:64) policy, [64] value
B_DEFAULT = 2
H = W = 8
C_IN, C_MID = 2, 16            # conv channel counts
CHUNK = W * C_MID              # 128  lanes of one h-row of conv activations (w*16 + c)
IN_LANES = C_IN * H * W        # 128  NCHW-flat input lanes (c*64 + h*8 + w)
CONV1_OUT = H * CHUNK          # 1024 conv1/conv2 activation lanes (h*128 + w*16 + c)

# rows of the packed [13,128,128] weight stack
_W2_ROW = 0        # rows 0..2  : conv2 per-ky blocks
_FC1_ROW = 3       # rows 3..10 : fc1 per-h blocks
_FC2_ROW = 11      # row 11     : fc2
_PV_ROW = 12       # row 12     : policy|value head
N_STACK = 13


# ----------------------------------------------------------------------------
# Single fused kernel.
# ----------------------------------------------------------------------------
def dummy_net_kernel(x_ref, w1_ref, wstk_ref, bias_ref, o_ref):
    bb = x_ref.shape[0]
    bias = bias_ref[...]                       # [8,128] f32
    b_c1 = bias[0:1, :]                        # conv1 bias tiled per w   (lane w*16+c)
    b_c2 = bias[1:2, :]                        # conv2 bias tiled per w
    b_f1 = bias[2:3, :]                        # fc1 bias (120 real lanes)
    b_f2 = bias[3:4, :]                        # fc2 bias (84 real lanes)
    b_pv = bias[4:5, :]                        # policy(64)|value(1) bias

    # --- conv1: one dense matmul; NCHW permutation + 3x3 structure baked into w1 ---
    x = x_ref[...].astype(jnp.bfloat16)                                   # [bb,128]
    z1 = jnp.dot(x, w1_ref[...], preferred_element_type=jnp.float32)     # [bb,1024]
    a1 = [jnp.maximum(z1[:, h * CHUNK:(h + 1) * CHUNK] + b_c1, 0.0)
          .astype(jnp.bfloat16) for h in range(H)]                        # 8 x [bb,128]

    # --- conv2 (3 ky blocks over static h-chunks) fused straight into the fc1 sum ---
    w2 = [wstk_ref[_W2_ROW + k] for k in range(3)]                        # 3 x [128,128]
    fc1_acc = jnp.zeros((bb, HEAD_WIDTH), jnp.float32) + b_f1
    for ho in range(H):
        acc = jnp.zeros((bb, CHUNK), jnp.float32) + b_c2
        for ky in range(3):
            hi = ho + ky - 1
            if 0 <= hi < H:                                              # h zero-pad
                acc = acc + jnp.dot(a1[hi], w2[ky],
                                    preferred_element_type=jnp.float32)
        a2c = jnp.maximum(acc, 0.0).astype(jnp.bfloat16)                  # conv2+relu chunk
        fc1_acc = fc1_acc + jnp.dot(a2c, wstk_ref[_FC1_ROW + ho],
                                    preferred_element_type=jnp.float32)
    h3 = jnp.maximum(fc1_acc, 0.0).astype(jnp.bfloat16)                   # fc1+relu [bb,128]

    # --- fc2 + relu ---
    z4 = jnp.dot(h3, wstk_ref[_FC2_ROW], preferred_element_type=jnp.float32) + b_f2
    h4 = jnp.maximum(z4, 0.0).astype(jnp.bfloat16)                        # [bb,128]

    # --- fused policy|value head, one lane-dense store ---
    z = jnp.dot(h4, wstk_ref[_PV_ROW], preferred_element_type=jnp.float32) + b_pv

    col = lax.broadcasted_iota(jnp.int32, z.shape, 1)
    is_pol = col < DN_OUTPUT_SIZE
    logits = jnp.where(is_pol, z, jnp.float32(-1e30))
    m = jnp.max(logits, axis=1, keepdims=True)
    e = jnp.where(is_pol, jnp.exp(logits - m), 0.0)
    s = jnp.sum(e, axis=1, keepdims=True)
    p = e / s                                  # exact divide (review correctness note)
    v = jnp.where(col == DN_OUTPUT_SIZE, jnp.tanh(z), 0.0)
    o_ref[...] = (p + v).astype(o_ref.dtype)


def _forward_call(x2d, w1, wstk, bias):
    b = x2d.shape[0]
    bb = b if b <= 128 else 128               # batch block; grid shards big batches
    assert b % bb == 0, "batch must be a multiple of the batch block"
    flops = 2 * b * (IN_LANES * CONV1_OUT            # conv1 dense
                     + 22 * CHUNK * CHUNK            # conv2 (22 block matmuls)
                     + H * CHUNK * HEAD_WIDTH        # fc1 (8 block matmuls)
                     + 2 * HEAD_WIDTH * HEAD_WIDTH)  # fc2 + head
    trans = 2 * b * HEAD_WIDTH                        # exp + tanh
    bytes_acc = (4 * x2d.size + 2 * (w1.size + wstk.size)
                 + 4 * bias.size + 4 * b * HEAD_WIDTH)
    return pl.pallas_call(
        dummy_net_kernel,
        out_shape=jax.ShapeDtypeStruct((b, HEAD_WIDTH), jnp.float32),
        grid_spec=pltpu.PrefetchScalarGridSpec(
            num_scalar_prefetch=0,
            grid=(b // bb,),
            in_specs=[pl.BlockSpec((bb, IN_LANES), lambda i: (i, 0)),
                      pl.BlockSpec((IN_LANES, CONV1_OUT), lambda i: (0, 0)),
                      pl.BlockSpec((N_STACK, 128, 128), lambda i: (0, 0, 0)),
                      pl.BlockSpec((8, 128), lambda i: (0, 0))],
            out_specs=pl.BlockSpec((bb, HEAD_WIDTH), lambda i: (i, 0))),
        compiler_params=pltpu.CompilerParams(dimension_semantics=("parallel",)),
        cost_estimate=pl.CostEstimate(flops=flops, transcendentals=trans,
                                      bytes_accessed=bytes_acc),
    )(x2d, w1, wstk, bias)


# ----------------------------------------------------------------------------
# Parameter init (deterministic, PyTorch-shaped) packed into kernel layouts.
# ----------------------------------------------------------------------------
def init_params(key):
    ks = jax.random.split(key, 12)

    def u(k, shape, fan_in):
        bound = 1.0 / float(np.sqrt(fan_in))
        return np.asarray(jax.random.uniform(k, shape, jnp.float32, -bound, bound))

    conv1_w = u(ks[0], (C_MID, C_IN, 3, 3), C_IN * 9)
    conv1_b = u(ks[1], (C_MID,), C_IN * 9)
    conv2_w = u(ks[2], (C_MID, C_MID, 3, 3), C_MID * 9)
    conv2_b = u(ks[3], (C_MID,), C_MID * 9)
    fc1_w = u(ks[4], (120, C_MID * H * W), C_MID * H * W)
    fc1_b = u(ks[5], (120,), C_MID * H * W)
    fc2_w = u(ks[6], (84, 120), 120)
    fc2_b = u(ks[7], (84,), 120)
    pol_w = u(ks[8], (DN_OUTPUT_SIZE, 84), 84)
    pol_b = u(ks[9], (DN_OUTPUT_SIZE,), 84)
    val_w = u(ks[10], (1, 84), 84)
    val_b = u(ks[11], (1,), 84)

    # conv1 as one dense matmul:
    #   input lane  i = c_in*64 + h_in*8 + w_in   (free reshape of NCHW)
    #   output lane j = h_out*128 + w_out*16 + c_out
    w1 = np.zeros((C_IN, H, W, H, W, C_MID), np.float32)
    for ky in range(3):
        for kx in range(3):
            tap = conv1_w[:, :, ky, kx].T                       # [c_in, c_out]
            for ho in range(H):
                hi = ho + ky - 1
                if not 0 <= hi < H:
                    continue
                for wo in range(W):
                    wi = wo + kx - 1
                    if 0 <= wi < W:
                        w1[:, hi, wi, ho, wo, :] = tap
    w1 = w1.reshape(IN_LANES, CONV1_OUT)

    # conv2 per-ky block weights over one h-row: [w_in*16+c_in, w_out*16+c_out]
    # (w-border zeros folded in; h handled by which chunks the kernel sums)
    w2 = np.zeros((3, W, C_MID, W, C_MID), np.float32)
    for ky in range(3):
        for kx in range(3):
            tap = conv2_w[:, :, ky, kx].T                       # [c_in, c_out]
            for wo in range(W):
                wi = wo + kx - 1
                if 0 <= wi < W:
                    w2[ky, wi, :, wo, :] = tap
    w2 = w2.reshape(3, CHUNK, CHUNK)

    # fc1 per-h blocks: rows = conv-chunk lane (w*16+c), cols = fc1 unit (120 -> pad 128)
    fc1_r = fc1_w.reshape(120, C_MID, H, W)                     # [j, c, h, w] torch flatten
    wf1 = np.zeros((H, W, C_MID, HEAD_WIDTH), np.float32)
    for h in range(H):
        wf1[h, :, :, :120] = np.transpose(fc1_r[:, :, h, :], (2, 1, 0))   # [w,c,j]
    wf1 = wf1.reshape(H, CHUNK, HEAD_WIDTH)

    # fc2 and fused policy|value head, zero-padded to 128x128
    wf2 = np.zeros((HEAD_WIDTH, HEAD_WIDTH), np.float32)
    wf2[:120, :84] = fc2_w.T
    wpv = np.zeros((HEAD_WIDTH, HEAD_WIDTH), np.float32)
    wpv[:84, :DN_OUTPUT_SIZE] = pol_w.T
    wpv[:84, DN_OUTPUT_SIZE] = val_w[0]

    wstk = np.concatenate([w2, wf1, wf2[None], wpv[None]], axis=0)   # [13,128,128]

    bias = np.zeros((8, HEAD_WIDTH), np.float32)
    bias[0] = np.tile(conv1_b, W)          # lane = w*16 + c
    bias[1] = np.tile(conv2_b, W)
    bias[2, :120] = fc1_b
    bias[3, :84] = fc2_b
    bias[4, :DN_OUTPUT_SIZE] = pol_b
    bias[4, DN_OUTPUT_SIZE] = val_b[0]

    return dict(w1=jnp.asarray(w1, jnp.bfloat16),
                wstk=jnp.asarray(wstk, jnp.bfloat16),
                bias=jnp.asarray(bias, jnp.float32))


@jax.jit
def dummy_network_forward(x_nchw, params):
    """x_nchw: [B, 2, 8, 8] float32 (PyTorch NCHW convention). Returns (p [B,64], v [B])."""
    b = x_nchw.shape[0]
    x2d = x_nchw.reshape(b, IN_LANES)      # free row-major reshape; no transpose op
    out = _forward_call(x2d, params["w1"], params["wstk"], params["bias"])  # [B,128]
    return out[:, :DN_OUTPUT_SIZE], out[:, DN_OUTPUT_SIZE]


if __name__ == "__main__":
    key = jax.random.PRNGKey(0)
    pkey, xkey = jax.random.split(key)
    params = init_params(pkey)
    x = jax.random.normal(xkey, (B_DEFAULT, 2, H, W), jnp.float32)

    p, v = dummy_network_forward(x, params)
    p, v = jax.block_until_ready((p, v))

    assert p.shape == (B_DEFAULT, DN_OUTPUT_SIZE) and v.shape == (B_DEFAULT,)
    assert bool(jnp.all(jnp.isfinite(p))) and bool(jnp.all(jnp.isfinite(v)))
    # softmax rows sum to 1 (exact divide), tanh value bounded
    assert bool(jnp.all(jnp.abs(jnp.sum(p, axis=1) - 1.0) < 1e-3))
    assert bool(jnp.all(jnp.abs(v) <= 1.0))
    print("KERNEL_OK")
</pallas_src>

<mosaic_0001>
module attributes {stable_mosaic.version = 11 : i64} {
  func.func @dummy_net_kernel(%arg0: i32, %arg1: memref<2x128xf32, #tpu.memory_space<vmem>>, %arg2: memref<128x1024xbf16, #tpu.memory_space<vmem>>, %arg3: memref<13x128x128xbf16, #tpu.memory_space<vmem>>, %arg4: memref<8x128xf32, #tpu.memory_space<vmem>>, %arg5: memref<2x128xf32, #tpu.memory_space<vmem>>) attributes {dimension_semantics = [#tpu.dimension_semantics<parallel>], iteration_bounds = array<i64: 1>, scalar_prefetch = 0 : i64, scratch_operands = 0 : i64, tpu.core_type = #tpu.core_type<tc>, window_params = [{transform_indices = @transform_0, window_bounds = array<i64: 2, 128>}, {pipeline_mode = #tpu.pipeline_mode<synchronous>, transform_indices = @transform_1, window_bounds = array<i64: 128, 1024>}, {pipeline_mode = #tpu.pipeline_mode<synchronous>, transform_indices = @transform_2, window_bounds = array<i64: 13, 128, 128>}, {pipeline_mode = #tpu.pipeline_mode<synchronous>, transform_indices = @transform_3, window_bounds = array<i64: 8, 128>}, {transform_indices = @transform_4, window_bounds = array<i64: 2, 128>}]} {
    %c0 = arith.constant 0 : index
    %c0_0 = arith.constant 0 : index
    %0 = vector.load %arg4[%c0, %c0_0] : memref<8x128xf32, #tpu.memory_space<vmem>>, vector<8x128xf32>
    %1 = vector.extract_strided_slice %0 {offsets = [0, 0], sizes = [1, 128], strides = [1, 1]} : vector<8x128xf32> to vector<1x128xf32>
    %2 = vector.extract_strided_slice %0 {offsets = [1, 0], sizes = [1, 128], strides = [1, 1]} : vector<8x128xf32> to vector<1x128xf32>
    %3 = vector.extract_strided_slice %0 {offsets = [2, 0], sizes = [1, 128], strides = [1, 1]} : vector<8x128xf32> to vector<1x128xf32>
    %4 = vector.extract_strided_slice %0 {offsets = [3, 0], sizes = [1, 128], strides = [1, 1]} : vector<8x128xf32> to vector<1x128xf32>
    %5 = vector.extract_strided_slice %0 {offsets = [4, 0], sizes = [1, 128], strides = [1, 1]} : vector<8x128xf32> to vector<1x128xf32>
    %c0_1 = arith.constant 0 : index
    %c0_2 = arith.constant 0 : index
    %6 = vector.load %arg1[%c0_1, %c0_2] : memref<2x128xf32, #tpu.memory_space<vmem>>, vector<2x128xf32>
    %7 = arith.truncf %6 : vector<2x128xf32> to vector<2x128xbf16>
    %c0_3 = arith.constant 0 : index
    %c0_4 = arith.constant 0 : index
    %8 = vector.load %arg2[%c0_3, %c0_4] : memref<128x1024xbf16, #tpu.memory_space<vmem>>, vector<128x1024xbf16>
    %cst = arith.constant dense<0.000000e+00> : vector<2x1024xf32>
    %9 = tpu.matmul %7, %8, %cst {dimension_numbers = #tpu.dot_dimension_numbers<[1], [0], [0], [1], [0, 0, 1, 1], [], []>} : vector<2x128xbf16>, vector<128x1024xbf16>, vector<2x1024xf32> -> vector<2x1024xf32>
    %10 = vector.extract_strided_slice %9 {offsets = [0, 0], sizes = [2, 128], strides = [1, 1]} : vector<2x1024xf32> to vector<2x128xf32>
    %11 = vector.broadcast %1 : vector<1x128xf32> to vector<2x128xf32>
    %12 = arith.addf %10, %11 : vector<2x128xf32>
    %cst_5 = arith.constant 0.000000e+00 : f32
    %13 = vector.broadcast %cst_5 : f32 to vector<2x128xf32>
    %14 = arith.maximumf %12, %13 : vector<2x128xf32>
    %15 = arith.truncf %14 : vector<2x128xf32> to vector<2x128xbf16>
    %16 = vector.extract_strided_slice %9 {offsets = [0, 128], sizes = [2, 128], strides = [1, 1]} : vector<2x1024xf32> to vector<2x128xf32>
    %17 = vector.broadcast %1 : vector<1x128xf32> to vector<2x128xf32>
    %18 = arith.addf %16, %17 : vector<2x128xf32>
    %cst_6 = arith.constant 0.000000e+00 : f32
    %19 = vector.broadcast %cst_6 : f32 to vector<2x128xf32>
    %20 = arith.maximumf %18, %19 : vector<2x128xf32>
    %21 = arith.truncf %20 : vector<2x128xf32> to vector<2x128xbf16>
    %22 = vector.extract_strided_slice %9 {offsets = [0, 256], sizes = [2, 128], strides = [1, 1]} : vector<2x1024xf32> to vector<2x128xf32>
    %23 = vector.broadcast %1 : vector<1x128xf32> to vector<2x128xf32>
    %24 = arith.addf %22, %23 : vector<2x128xf32>
    %cst_7 = arith.constant 0.000000e+00 : f32
    %25 = vector.broadcast %cst_7 : f32 to vector<2x128xf32>
    %26 = arith.maximumf %24, %25 : vector<2x128xf32>
    %27 = arith.truncf %26 : vector<2x128xf32> to vector<2x128xbf16>
    %28 = vector.extract_strided_slice %9 {offsets = [0, 384], sizes = [2, 128], strides = [1, 1]} : vector<2x1024xf32> to vector<2x128xf32>
    %29 = vector.broadcast %1 : vector<1x128xf32> to vector<2x128xf32>
    %30 = arith.addf %28, %29 : vector<2x128xf32>
    %cst_8 = arith.constant 0.000000e+00 : f32
    %31 = vector.broadcast %cst_8 : f32 to vector<2x128xf32>
    %32 = arith.maximumf %30, %31 : vector<2x128xf32>
    %33 = arith.truncf %32 : vector<2x128xf32> to vector<2x128xbf16>
    %34 = vector.extract_strided_slice %9 {offsets = [0, 512], sizes = [2, 128], strides = [1, 1]} : vector<2x1024xf32> to vector<2x128xf32>
    %35 = vector.broadcast %1 : vector<1x128xf32> to vector<2x128xf32>
    %36 = arith.addf %34, %35 : vector<2x128xf32>
    %cst_9 = arith.constant 0.000000e+00 : f32
    %37 = vector.broadcast %cst_9 : f32 to vector<2x128xf32>
    %38 = arith.maximumf %36, %37 : vector<2x128xf32>
    %39 = arith.truncf %38 : vector<2x128xf32> to vector<2x128xbf16>
    %40 = vector.extract_strided_slice %9 {offsets = [0, 640], sizes = [2, 128], strides = [1, 1]} : vector<2x1024xf32> to vector<2x128xf32>
    %41 = vector.broadcast %1 : vector<1x128xf32> to vector<2x128xf32>
    %42 = arith.addf %40, %41 : vector<2x128xf32>
    %cst_10 = arith.constant 0.000000e+00 : f32
    %43 = vector.broadcast %cst_10 : f32 to vector<2x128xf32>
    %44 = arith.maximumf %42, %43 : vector<2x128xf32>
    %45 = arith.truncf %44 : vector<2x128xf32> to vector<2x128xbf16>
    %46 = vector.extract_strided_slice %9 {offsets = [0, 768], sizes = [2, 128], strides = [1, 1]} : vector<2x1024xf32> to vector<2x128xf32>
    %47 = vector.broadcast %1 : vector<1x128xf32> to vector<2x128xf32>
    %48 = arith.addf %46, %47 : vector<2x128xf32>
    %cst_11 = arith.constant 0.000000e+00 : f32
    %49 = vector.broadcast %cst_11 : f32 to vector<2x128xf32>
    %50 = arith.maximumf %48, %49 : vector<2x128xf32>
    %51 = arith.truncf %50 : vector<2x128xf32> to vector<2x128xbf16>
    %52 = vector.extract_strided_slice %9 {offsets = [0, 896], sizes = [2, 128], strides = [1, 1]} : vector<2x1024xf32> to vector<2x128xf32>
    %53 = vector.broadcast %1 : vector<1x128xf32> to vector<2x128xf32>
    %54 = arith.addf %52, %53 : vector<2x128xf32>
    %cst_12 = arith.constant 0.000000e+00 : f32
    %55 = vector.broadcast %cst_12 : f32 to vector<2x128xf32>
    %56 = arith.maximumf %54, %55 : vector<2x128xf32>
    %57 = arith.truncf %56 : vector<2x128xf32> to vector<2x128xbf16>
    %c0_13 = arith.constant 0 : index
    %c0_14 = arith.constant 0 : index
    %c0_15 = arith.constant 0 : index
    %58 = vector.load %arg3[%c0_13, %c0_14, %c0_15] : memref<13x128x128xbf16, #tpu.memory_space<vmem>>, vector<1x128x128xbf16>
    %59 = vector.shape_cast %58 : vector<1x128x128xbf16> to vector<128x128xbf16>
    %c1 = arith.constant 1 : index
    %c0_16 = arith.constant 0 : index
    %c0_17 = arith.constant 0 : index
    %60 = vector.load %arg3[%c1, %c0_16, %c0_17] : memref<13x128x128xbf16, #tpu.memory_space<vmem>>, vector<1x128x128xbf16>
    %61 = vector.shape_cast %60 : vector<1x128x128xbf16> to vector<128x128xbf16>
    %c2 = arith.constant 2 : index
    %c0_18 = arith.constant 0 : index
    %c0_19 = arith.constant 0 : index
    %62 = vector.load %arg3[%c2, %c0_18, %c0_19] : memref<13x128x128xbf16, #tpu.memory_space<vmem>>, vector<1x128x128xbf16>
    %63 = vector.shape_cast %62 : vector<1x128x128xbf16> to vector<128x128xbf16>
    %cst_20 = arith.constant 0.000000e+00 : f32
    %64 = vector.broadcast %cst_20 : f32 to vector<2x128xf32>
    %65 = vector.broadcast %3 : vector<1x128xf32> to vector<2x128xf32>
    %66 = arith.addf %64, %65 : vector<2x128xf32>
    %cst_21 = arith.constant 0.000000e+00 : f32
    %67 = vector.broadcast %cst_21 : f32 to vector<2x128xf32>
    %68 = vector.broadcast %2 : vector<1x128xf32> to vector<2x128xf32>
    %69 = arith.addf %67, %68 : vector<2x128xf32>
    %cst_22 = arith.constant dense<0.000000e+00> : vector<2x128xf32>
    %70 = tpu.matmul %15, %61, %cst_22 {dimension_numbers = #tpu.dot_dimension_numbers<[1], [0], [0], [1], [0, 0, 1, 1], [], []>} : vector<2x128xbf16>, vector<128x128xbf16>, vector<2x128xf32> -> vector<2x128xf32>
    %71 = arith.addf %69, %70 : vector<2x128xf32>
    %cst_23 = arith.constant dense<0.000000e+00> : vector<2x128xf32>
    %72 = tpu.matmul %21, %63, %cst_23 {dimension_numbers = #tpu.dot_dimension_numbers<[1], [0], [0], [1], [0, 0, 1, 1], [], []>} : vector<2x128xbf16>, vector<128x128xbf16>, vector<2x128xf32> -> vector<2x128xf32>
    %73 = arith.addf %71, %72 : vector<2x128xf32>
    %cst_24 = arith.constant 0.000000e+00 : f32
    %74 = vector.broadcast %cst_24 : f32 to vector<2x128xf32>
    %75 = arith.maximumf %73, %74 : vector<2x128xf32>
    %76 = arith.truncf %75 : vector<2x128xf32> to vector<2x128xbf16>
    %c3 = arith.constant 3 : index
    %c0_25 = arith.constant 0 : index
    %c0_26 = arith.constant 0 : index
    %77 = vector.load %arg3[%c3, %c0_25, %c0_26] : memref<13x128x128xbf16, #tpu.memory_space<vmem>>, vector<1x128x128xbf16>
    %78 = vector.shape_cast %77 : vector<1x128x128xbf16> to vector<128x128xbf16>
    %cst_27 = arith.constant dense<0.000000e+00> : vector<2x128xf32>
    %79 = tpu.matmul %76, %78, %cst_27 {dimension_numbers = #tpu.dot_dimension_numbers<[1], [0], [0], [1], [0, 0, 1, 1], [], []>} : vector<2x128xbf16>, vector<128x128xbf16>, vector<2x128xf32> -> vector<2x128xf32>
    %80 = arith.addf %66, %79 : vector<2x128xf32>
    %cst_28 = arith.constant 0.000000e+00 : f32
    %81 = vector.broadcast %cst_28 : f32 to vector<2x128xf32>
    %82 = vector.broadcast %2 : vector<1x128xf32> to vector<2x128xf32>
    %83 = arith.addf %81, %82 : vector<2x128xf32>
    %cst_29 = arith.constant dense<0.000000e+00> : vector<2x128xf32>
    %84 = tpu.matmul %15, %59, %cst_29 {dimension_numbers = #tpu.dot_dimension_numbers<[1], [0], [0], [1], [0, 0, 1, 1], [], []>} : vector<2x128xbf16>, vector<128x128xbf16>, vector<2x128xf32> -> vector<2x128xf32>
    %85 = arith.addf %83, %84 : vector<2x128xf32>
    %cst_30 = arith.constant dense<0.000000e+00> : vector<2x128xf32>
    %86 = tpu.matmul %21, %61, %cst_30 {dimension_numbers = #tpu.dot_dimension_numbers<[1], [0], [0], [1], [0, 0, 1, 1], [], []>} : vector<2x128xbf16>, vector<128x128xbf16>, vector<2x128xf32> -> vector<2x128xf32>
    %87 = arith.addf %85, %86 : vector<2x128xf32>
    %cst_31 = arith.constant dense<0.000000e+00> : vector<2x128xf32>
    %88 = tpu.matmul %27, %63, %cst_31 {dimension_numbers = #tpu.dot_dimension_numbers<[1], [0], [0], [1], [0, 0, 1, 1], [], []>} : vector<2x128xbf16>, vector<128x128xbf16>, vector<2x128xf32> -> vector<2x128xf32>
    %89 = arith.addf %87, %88 : vector<2x128xf32>
    %cst_32 = arith.constant 0.000000e+00 : f32
    %90 = vector.broadcast %cst_32 : f32 to vector<2x128xf32>
    %91 = arith.maximumf %89, %90 : vector<2x128xf32>
    %92 = arith.truncf %91 : vector<2x128xf32> to vector<2x128xbf16>
    %c4 = arith.constant 4 : index
    %c0_33 = arith.constant 0 : index
    %c0_34 = arith.constant 0 : index
    %93 = vector.load %arg3[%c4, %c0_33, %c0_34] : memref<13x128x128xbf16, #tpu.memory_space<vmem>>, vector<1x128x128xbf16>
    %94 = vector.shape_cast %93 : vector<1x128x128xbf16> to vector<128x128xbf16>
    %cst_35 = arith.constant dense<0.000000e+00> : vector<2x128xf32>
    %95 = tpu.matmul %92, %94, %cst_35 {dimension_numbers = #tpu.dot_dimension_numbers<[1], [0], [0], [1], [0, 0, 1, 1], [], []>} : vector<2x128xbf16>, vector<128x128xbf16>, vector<2x128xf32> -> vector<2x128xf32>
    %96 = arith.addf %80, %95 : vector<2x128xf32>
    %cst_36 = arith.constant 0.000000e+00 : f32
    %97 = vector.broadcast %cst_36 : f32 to vector<2x128xf32>
    %98 = vector.broadcast %2 : vector<1x128xf32> to vector<2x128xf32>
    %99 = arith.addf %97, %98 : vector<2x128xf32>
    %cst_37 = arith.constant dense<0.000000e+00> : vector<2x128xf32>
    %100 = tpu.matmul %21, %59, %cst_37 {dimension_numbers = #tpu.dot_dimension_numbers<[1], [0], [0], [1], [0, 0, 1, 1], [], []>} : vector<2x128xbf16>, vector<128x128xbf16>, vector<2x128xf32> -> vector<2x128xf32>
    %101 = arith.addf %99, %100 : vector<2x128xf32>
    %cst_38 = arith.constant dense<0.000000e+00> : vector<2x128xf32>
    %102 = tpu.matmul %27, %61, %cst_38 {dimension_numbers = #tpu.dot_dimension_numbers<[1], [0], [0], [1], [0, 0, 1, 1], [], []>} : vector<2x128xbf16>, vector<128x128xbf16>, vector<2x128xf32> -> vector<2x128xf32>
    %103 = arith.addf %101, %102 : vector<2x128xf32>
    %cst_39 = arith.constant dense<0.000000e+00> : vector<2x128xf32>
    %104 = tpu.matmul %33, %63, %cst_39 {dimension_numbers = #tpu.dot_dimension_numbers<[1], [0], [0], [1], [0, 0, 1, 1], [], []>} : vector<2x128xbf16>, vector<128x128xbf16>, vector<2x128xf32> -> vector<2x128xf32>
    %105 = arith.addf %103, %104 : vector<2x128xf32>
    %cst_40 = arith.constant 0.000000e+00 : f32
    %106 = vector.broadcast %cst_40 : f32 to vector<2x128xf32>
    %107 = arith.maximumf %105, %106 : vector<2x128xf32>
    %108 = arith.truncf %107 : vector<2x128xf32> to vector<2x128xbf16>
    %c5 = arith.constant 5 : index
    %c0_41 = arith.constant 0 : index
    %c0_42 = arith.constant 0 : index
    %109 = vector.load %arg3[%c5, %c0_41, %c0_42] : memref<13x128x128xbf16, #tpu.memory_space<vmem>>, vector<1x128x128xbf16>
    %110 = vector.shape_cast %109 : vector<1x128x128xbf16> to vector<128x128xbf16>
    %cst_43 = arith.constant dense<0.000000e+00> : vector<2x128xf32>
    %111 = tpu.matmul %108, %110, %cst_43 {dimension_numbers = #tpu.dot_dimension_numbers<[1], [0], [0], [1], [0, 0, 1, 1], [], []>} : vector<2x128xbf16>, vector<128x128xbf16>, vector<2x128xf32> -> vector<2x128xf32>
    %112 = arith.addf %96, %111 : vector<2x128xf32>
    %cst_44 = arith.constant 0.000000e+00 : f32
    %113 = vector.broadcast %cst_44 : f32 to vector<2x128xf32>
    %114 = vector.broadcast %2 : vector<1x128xf32> to vector<2x128xf32>
    %115 = arith.addf %113, %114 : vector<2x128xf32>
    %cst_45 = arith.constant dense<0.000000e+00> : vector<2x128xf32>
    %116 = tpu.matmul %27, %59, %cst_45 {dimension_numbers = #tpu.dot_dimension_numbers<[1], [0], [0], [1], [0, 0, 1, 1], [], []>} : vector<2x128xbf16>, vector<128x128xbf16>, vector<2x128xf32> -> vector<2x128xf32>
    %117 = arith.addf %115, %116 : vector<2x128xf32>
    %cst_46 = arith.constant dense<0.000000e+00> : vector<2x128xf32>
    %118 = tpu.matmul %33, %61, %cst_46 {dimension_numbers = #tpu.dot_dimension_numbers<[1], [0], [0], [1], [0, 0, 1, 1], [], []>} : vector<2x128xbf16>, vector<128x128xbf16>, vector<2x128xf32> -> vector<2x128xf32>
    %119 = arith.addf %117, %118 : vector<2x128xf32>
    %cst_47 = arith.constant dense<0.000000e+00> : vector<2x128xf32>
    %120 = tpu.matmul %39, %63, %cst_47 {dimension_numbers = #tpu.dot_dimension_numbers<[1], [0], [0], [1], [0, 0, 1, 1], [], []>} : vector<2x128xbf16>, vector<128x128xbf16>, vector<2x128xf32> -> vector<2x128xf32>
    %121 = arith.addf %119, %120 : vector<2x128xf32>
    %cst_48 = arith.constant 0.000000e+00 : f32
    %122 = vector.broadcast %cst_48 : f32 to vector<2x128xf32>
    %123 = arith.maximumf %121, %122 : vector<2x128xf32>
    %124 = arith.truncf %123 : vector<2x128xf32> to vector<2x128xbf16>
    %c6 = arith.constant 6 : index
    %c0_49 = arith.constant 0 : index
    %c0_50 = arith.constant 0 : index
    %125 = vector.load %arg3[%c6, %c0_49, %c0_50] : memref<13x128x128xbf16, #tpu.memory_space<vmem>>, vector<1x128x128xbf16>
    %126 = vector.shape_cast %125 : vector<1x128x128xbf16> to vector<128x128xbf16>
    %cst_51 = arith.constant dense<0.000000e+00> : vector<2x128xf32>
    %127 = tpu.matmul %124, %126, %cst_51 {dimension_numbers = #tpu.dot_dimension_numbers<[1], [0], [0], [1], [0, 0, 1, 1], [], []>} : vector<2x128xbf16>, vector<128x128xbf16>, vector<2x128xf32> -> vector<2x128xf32>
    %128 = arith.addf %112, %127 : vector<2x128xf32>
    %cst_52 = arith.constant 0.000000e+00 : f32
    %129 = vector.broadcast %cst_52 : f32 to vector<2x128xf32>
    %130 = vector.broadcast %2 : vector<1x128xf32> to vector<2x128xf32>
    %131 = arith.addf %129, %130 : vector<2x128xf32>
    %cst_53 = arith.constant dense<0.000000e+00> : vector<2x128xf32>
    %132 = tpu.matmul %33, %59, %cst_53 {dimension_numbers = #tpu.dot_dimension_numbers<[1], [0], [0], [1], [0, 0, 1, 1], [], []>} : vector<2x128xbf16>, vector<128x128xbf16>, vector<2x128xf32> -> vector<2x128xf32>
    %133 = arith.addf %131, %132 : vector<2x128xf32>
    %cst_54 = arith.constant dense<0.000000e+00> : vector<2x128xf32>
    %134 = tpu.matmul %39, %61, %cst_54 {dimension_numbers = #tpu.dot_dimension_numbers<[1], [0], [0], [1], [0, 0, 1, 1], [], []>} : vector<2x128xbf16>, vector<128x128xbf16>, vector<2x128xf32> -> vector<2x128xf32>
    %135 = arith.addf %133, %134 : vector<2x128xf32>
    %cst_55 = arith.constant dense<0.000000e+00> : vector<2x128xf32>
    %136 = tpu.matmul %45, %63, %cst_55 {dimension_numbers = #tpu.dot_dimension_numbers<[1], [0], [0], [1], [0, 0, 1, 1], [], []>} : vector<2x128xbf16>, vector<128x128xbf16>, vector<2x128xf32> -> vector<2x128xf32>
    %137 = arith.addf %135, %136 : vector<2x128xf32>
    %cst_56 = arith.constant 0.000000e+00 : f32
    %138 = vector.broadcast %cst_56 : f32 to vector<2x128xf32>
    %139 = arith.maximumf %137, %138 : vector<2x128xf32>
    %140 = arith.truncf %139 : vector<2x128xf32> to vector<2x128xbf16>
    %c7 = arith.constant 7 : index
    %c0_57 = arith.constant 0 : index
    %c0_58 = arith.constant 0 : index
    %141 = vector.load %arg3[%c7, %c0_57, %c0_58] : memref<13x128x128xbf16, #tpu.memory_space<vmem>>, vector<1x128x128xbf16>
    %142 = vector.shape_cast %141 : vector<1x128x128xbf16> to vector<128x128xbf16>
    %cst_59 = arith.constant dense<0.000000e+00> : vector<2x128xf32>
    %143 = tpu.matmul %140, %142, %cst_59 {dimension_numbers = #tpu.dot_dimension_numbers<[1], [0], [0], [1], [0, 0, 1, 1], [], []>} : vector<2x128xbf16>, vector<128x128xbf16>, vector<2x128xf32> -> vector<2x128xf32>
    %144 = arith.addf %128, %143 : vector<2x128xf32>
    %cst_60 = arith.constant 0.000000e+00 : f32
    %145 = vector.broadcast %cst_60 : f32 to vector<2x128xf32>
    %146 = vector.broadcast %2 : vector<1x128xf32> to vector<2x128xf32>
    %147 = arith.addf %145, %146 : vector<2x128xf32>
    %cst_61 = arith.constant dense<0.000000e+00> : vector<2x128xf32>
    %148 = tpu.matmul %39, %59, %cst_61 {dimension_numbers = #tpu.dot_dimension_numbers<[1], [0], [0], [1], [0, 0, 1, 1], [], []>} : vector<2x128xbf16>, vector<128x128xbf16>, vector<2x128xf32> -> vector<2x128xf32>
    %149 = arith.addf %147, %148 : vector<2x128xf32>
    %cst_62 = arith.constant dense<0.000000e+00> : vector<2x128xf32>
    %150 = tpu.matmul %45, %61, %cst_62 {dimension_numbers = #tpu.dot_dimension_numbers<[1], [0], [0], [1], [0, 0, 1, 1], [], []>} : vector<2x128xbf16>, vector<128x128xbf16>, vector<2x128xf32> -> vector<2x128xf32>
    %151 = arith.addf %149, %150 : vector<2x128xf32>
    %cst_63 = arith.constant dense<0.000000e+00> : vector<2x128xf32>
    %152 = tpu.matmul %51, %63, %cst_63 {dimension_numbers = #tpu.dot_dimension_numbers<[1], [0], [0], [1], [0, 0, 1, 1], [], []>} : vector<2x128xbf16>, vector<128x128xbf16>, vector<2x128xf32> -> vector<2x128xf32>
    %153 = arith.addf %151, %152 : vector<2x128xf32>
    %cst_64 = arith.constant 0.000000e+00 : f32
    %154 = vector.broadcast %cst_64 : f32 to vector<2x128xf32>
    %155 = arith.maximumf %153, %154 : vector<2x128xf32>
    %156 = arith.truncf %155 : vector<2x128xf32> to vector<2x128xbf16>
    %c8 = arith.constant 8 : index
    %c0_65 = arith.constant 0 : index
    %c0_66 = arith.constant 0 : index
    %157 = vector.load %arg3[%c8, %c0_65, %c0_66] : memref<13x128x128xbf16, #tpu.memory_space<vmem>>, vector<1x128x128xbf16>
    %158 = vector.shape_cast %157 : vector<1x128x128xbf16> to vector<128x128xbf16>
    %cst_67 = arith.constant dense<0.000000e+00> : vector<2x128xf32>
    %159 = tpu.matmul %156, %158, %cst_67 {dimension_numbers = #tpu.dot_dimension_numbers<[1], [0], [0], [1], [0, 0, 1, 1], [], []>} : vector<2x128xbf16>, vector<128x128xbf16>, vector<2x128xf32> -> vector<2x128xf32>
    %160 = arith.addf %144, %159 : vector<2x128xf32>
    %cst_68 = arith.constant 0.000000e+00 : f32
    %161 = vector.broadcast %cst_68 : f32 to vector<2x128xf32>
    %162 = vector.broadcast %2 : vector<1x128xf32> to vector<2x128xf32>
    %163 = arith.addf %161, %162 : vector<2x128xf32>
    %cst_69 = arith.constant dense<0.000000e+00> : vector<2x128xf32>
    %164 = tpu.matmul %45, %59, %cst_69 {dimension_numbers = #tpu.dot_dimension_numbers<[1], [0], [0], [1], [0, 0, 1, 1], [], []>} : vector<2x128xbf16>, vector<128x128xbf16>, vector<2x128xf32> -> vector<2x128xf32>
    %165 = arith.addf %163, %164 : vector<2x128xf32>
    %cst_70 = arith.constant dense<0.000000e+00> : vector<2x128xf32>
    %166 = tpu.matmul %51, %61, %cst_70 {dimension_numbers = #tpu.dot_dimension_numbers<[1], [0], [0], [1], [0, 0, 1, 1], [], []>} : vector<2x128xbf16>, vector<128x128xbf16>, vector<2x128xf32> -> vector<2x128xf32>
    %167 = arith.addf %165, %166 : vector<2x128xf32>
    %cst_71 = arith.constant dense<0.000000e+00> : vector<2x128xf32>
    %168 = tpu.matmul %57, %63, %cst_71 {dimension_numbers = #tpu.dot_dimension_numbers<[1], [0], [0], [1], [0, 0, 1, 1], [], []>} : vector<2x128xbf16>, vector<128x128xbf16>, vector<2x128xf32> -> vector<2x128xf32>
    %169 = arith.addf %167, %168 : vector<2x128xf32>
    %cst_72 = arith.constant 0.000000e+00 : f32
    %170 = vector.broadcast %cst_72 : f32 to vector<2x128xf32>
    %171 = arith.maximumf %169, %170 : vector<2x128xf32>
    %172 = arith.truncf %171 : vector<2x128xf32> to vector<2x128xbf16>
    %c9 = arith.constant 9 : index
    %c0_73 = arith.constant 0 : index
    %c0_74 = arith.constant 0 : index
    %173 = vector.load %arg3[%c9, %c0_73, %c0_74] : memref<13x128x128xbf16, #tpu.memory_space<vmem>>, vector<1x128x128xbf16>
    %174 = vector.shape_cast %173 : vector<1x128x128xbf16> to vector<128x128xbf16>
    %cst_75 = arith.constant dense<0.000000e+00> : vector<2x128xf32>
    %175 = tpu.matmul %172, %174, %cst_75 {dimension_numbers = #tpu.dot_dimension_numbers<[1], [0], [0], [1], [0, 0, 1, 1], [], []>} : vector<2x128xbf16>, vector<128x128xbf16>, vector<2x128xf32> -> vector<2x128xf32>
    %176 = arith.addf %160, %175 : vector<2x128xf32>
    %cst_76 = arith.constant 0.000000e+00 : f32
    %177 = vector.broadcast %cst_76 : f32 to vector<2x128xf32>
    %178 = vector.broadcast %2 : vector<1x128xf32> to vector<2x128xf32>
    %179 = arith.addf %177, %178 : vector<2x128xf32>
    %cst_77 = arith.constant dense<0.000000e+00> : vector<2x128xf32>
    %180 = tpu.matmul %51, %59, %cst_77 {dimension_numbers = #tpu.dot_dimension_numbers<[1], [0], [0], [1], [0, 0, 1, 1], [], []>} : vector<2x128xbf16>, vector<128x128xbf16>, vector<2x128xf32> -> vector<2x128xf32>
    %181 = arith.addf %179, %180 : vector<2x128xf32>
    %cst_78 = arith.constant dense<0.000000e+00> : vector<2x128xf32>
    %182 = tpu.matmul %57, %61, %cst_78 {dimension_numbers = #tpu.dot_dimension_numbers<[1], [0], [0], [1], [0, 0, 1, 1], [], []>} : vector<2x128xbf16>, vector<128x128xbf16>, vector<2x128xf32> -> vector<2x128xf32>
    %183 = arith.addf %181, %182 : vector<2x128xf32>
    %cst_79 = arith.constant 0.000000e+00 : f32
    %184 = vector.broadcast %cst_79 : f32 to vector<2x128xf32>
    %185 = arith.maximumf %183, %184 : vector<2x128xf32>
    %186 = arith.truncf %185 : vector<2x128xf32> to vector<2x128xbf16>
    %c10 = arith.constant 10 : index
    %c0_80 = arith.constant 0 : index
    %c0_81 = arith.constant 0 : index
    %187 = vector.load %arg3[%c10, %c0_80, %c0_81] : memref<13x128x128xbf16, #tpu.memory_space<vmem>>, vector<1x128x128xbf16>
    %188 = vector.shape_cast %187 : vector<1x128x128xbf16> to vector<128x128xbf16>
    %cst_82 = arith.constant dense<0.000000e+00> : vector<2x128xf32>
    %189 = tpu.matmul %186, %188, %cst_82 {dimension_numbers = #tpu.dot_dimension_numbers<[1], [0], [0], [1], [0, 0, 1, 1], [], []>} : vector<2x128xbf16>, vector<128x128xbf16>, vector<2x128xf32> -> vector<2x128xf32>
    %190 = arith.addf %176, %189 : vector<2x128xf32>
    %cst_83 = arith.constant 0.000000e+00 : f32
    %191 = vector.broadcast %cst_83 : f32 to vector<2x128xf32>
    %192 = arith.maximumf %190, %191 : vector<2x128xf32>
    %193 = arith.truncf %192 : vector<2x128xf32> to vector<2x128xbf16>
    %c11 = arith.constant 11 : index
    %c0_84 = arith.constant 0 : index
    %c0_85 = arith.constant 0 : index
    %194 = vector.load %arg3[%c11, %c0_84, %c0_85] : memref<13x128x128xbf16, #tpu.memory_space<vmem>>, vector<1x128x128xbf16>
    %195 = vector.shape_cast %194 : vector<1x128x128xbf16> to vector<128x128xbf16>
    %cst_86 = arith.constant dense<0.000000e+00> : vector<2x128xf32>
    %196 = tpu.matmul %193, %195, %cst_86 {dimension_numbers = #tpu.dot_dimension_numbers<[1], [0], [0], [1], [0, 0, 1, 1], [], []>} : vector<2x128xbf16>, vector<128x128xbf16>, vector<2x128xf32> -> vector<2x128xf32>
    %197 = vector.broadcast %4 : vector<1x128xf32> to vector<2x128xf32>
    %198 = arith.addf %196, %197 : vector<2x128xf32>
    %cst_87 = arith.constant 0.000000e+00 : f32
    %199 = vector.broadcast %cst_87 : f32 to vector<2x128xf32>
    %200 = arith.maximumf %198, %199 : vector<2x128xf32>
    %201 = arith.truncf %200 : vector<2x128xf32> to vector<2x128xbf16>
    %c12 = arith.constant 12 : index
    %c0_88 = arith.constant 0 : index
    %c0_89 = arith.constant 0 : index
    %202 = vector.load %arg3[%c12, %c0_88, %c0_89] : memref<13x128x128xbf16, #tpu.memory_space<vmem>>, vector<1x128x128xbf16>
    %203 = vector.shape_cast %202 : vector<1x128x128xbf16> to vector<128x128xbf16>
    %cst_90 = arith.constant dense<0.000000e+00> : vector<2x128xf32>
    %204 = tpu.matmul %201, %203, %cst_90 {dimension_numbers = #tpu.dot_dimension_numbers<[1], [0], [0], [1], [0, 0, 1, 1], [], []>} : vector<2x128xbf16>, vector<128x128xbf16>, vector<2x128xf32> -> vector<2x128xf32>
    %205 = vector.broadcast %5 : vector<1x128xf32> to vector<2x128xf32>
    %206 = arith.addf %204, %205 : vector<2x128xf32>
    %207 = tpu.iota {dimensions = array<i32: 1>} : vector<2x128xi32>
    %c64_i32 = arith.constant 64 : i32
    %208 = vector.broadcast %c64_i32 : i32 to vector<2x128xi32>
    %209 = arith.cmpi slt, %207, %208 : vector<2x128xi32>
    %cst_91 = arith.constant -1.000000e+30 : f32
    %210 = vector.broadcast %cst_91 : f32 to vector<2x128xf32>
    %211 = arith.select %209, %206, %210 : vector<2x128xi1>, vector<2x128xf32>
    %cst_92 = arith.constant dense<0xFF800000> : vector<2xf32>
    %212 = vector.multi_reduction <maximumf>, %211, %cst_92 [1] : vector<2x128xf32> to vector<2xf32>
    %213 = vector.shape_cast %212 : vector<2xf32> to vector<2x1xf32>
    %214 = vector.broadcast %213 : vector<2x1xf32> to vector<2x128xf32>
    %215 = arith.subf %211, %214 : vector<2x128xf32>
    %216 = math.exp %215 : vector<2x128xf32>
    %cst_93 = arith.constant 0.000000e+00 : f32
    %217 = vector.broadcast %cst_93 : f32 to vector<2x128xf32>
    %218 = arith.select %209, %216, %217 : vector<2x128xi1>, vector<2x128xf32>
    %cst_94 = arith.constant dense<0.000000e+00> : vector<2xf32>
    %219 = vector.multi_reduction <add>, %218, %cst_94 [1] : vector<2x128xf32> to vector<2xf32>
    %220 = vector.shape_cast %219 : vector<2xf32> to vector<2x1xf32>
    %221 = vector.broadcast %220 : vector<2x1xf32> to vector<2x128xf32>
    %222 = arith.divf %218, %221 : vector<2x128xf32>
    %c64_i32_95 = arith.constant 64 : i32
    %223 = vector.broadcast %c64_i32_95 : i32 to vector<2x128xi32>
    %224 = arith.cmpi eq, %207, %223 : vector<2x128xi32>
    %225 = math.tanh %206 : vector<2x128xf32>
    %cst_96 = arith.constant 0.000000e+00 : f32
    %226 = vector.broadcast %cst_96 : f32 to vector<2x128xf32>
    %227 = arith.select %224, %225, %226 : vector<2x128xi1>, vector<2x128xf32>
    %228 = arith.addf %222, %227 : vector<2x128xf32>
    %c0_97 = arith.constant 0 : index
    %c0_98 = arith.constant 0 : index
    %229 = vector.load %arg5[%c0_97, %c0_98] : memref<2x128xf32, #tpu.memory_space<vmem>>, vector<2x128xf32>
    tpu.vector_store %arg5[%c0_97, %c0_98], %228 {strides = array<i32>} : memref<2x128xf32, #tpu.memory_space<vmem>>, vector<2x128xf32>,
    return
  }
  func.func @transform_0(%arg0: i32) -> (i32, i32) {
    %c0_i32 = arith.constant 0 : i32
    %c0_i32_0 = arith.constant 0 : i32
    return %arg0, %c0_i32 : i32, i32
  }
  func.func @transform_1(%arg0: i32) -> (i32, i32) {
    %c0_i32 = arith.constant 0 : i32
    %c0_i32_0 = arith.constant 0 : i32
    %c0_i32_1 = arith.constant 0 : i32
    return %c0_i32, %c0_i32_0 : i32, i32
  }
  func.func @transform_2(%arg0: i32) -> (i32, i32, i32) {
    %c0_i32 = arith.constant 0 : i32
    %c0_i32_0 = arith.constant 0 : i32
    %c0_i32_1 = arith.constant 0 : i32
    %c0_i32_2 = arith.constant 0 : i32
    return %c0_i32, %c0_i32_0, %c0_i32_1 : i32, i32, i32
  }
  func.func @transform_3(%arg0: i32) -> (i32, i32) {
    %c0_i32 = arith.constant 0 : i32
    %c0_i32_0 = arith.constant 0 : i32
    %c0_i32_1 = arith.constant 0 : i32
    return %c0_i32, %c0_i32_0 : i32, i32
  }
  func.func @transform_4(%arg0: i32) -> (i32, i32) {
    %c0_i32 = arith.constant 0 : i32
    %c0_i32_0 = arith.constant 0 : i32
    return %arg0, %c0_i32 : i32, i32
  }
}

</mosaic_0001>

<bundles_post_ra>
// kernel: dummy_network_forward.1
= control target key start
LH: loop header
LB: loop body
LE: loop exit
PB: predicated region body
PF: predicated region fallthrough
CT: control target
= control target key end

     0   :  { %9 = vsyncpa [#allocation3], 0  ;;  %s4955_s0 = inlined_call_operand.vmem [shape: f32[2,128], index: 0, kind: input, shape index: {}]   ;;  %s4956_s1 = inlined_call_operand.hbm [shape: bf16[128,1024], index: 1, kind: input, shape index: {}]   ;;  %s4957_s2 = inlined_call_operand.hbm [shape: bf16[13,128,128], index: 2, kind: input, shape index: {}]   ;;  %s4958_s3 = inlined_call_operand.vmem [shape: f32[8,128], index: 3, kind: input, shape index: {}]   ;;  %s4959_s4 = inlined_call_operand.vmem [shape: f32[2,128], index: 4, kind: output, shape index: {}]  }
   0x1   :  { %10 = vsyncpa [#allocation5], 0  ;;  %s4220_s15 = smov [#allocation2]   ;;  %s4172_s19 = scalar_lea.hbm %s4956_s1, 8192 }
   0x2   :  { %s18_s16 = sshll.u32 %s4220_s15, 4  ;;  %p4173_p0 = scmp.ne.s32.totalorder %s4956_s1, %s4172_s19  ;;  %s19_s16 = int_to_ptr.vmem [resolvable:$true] %s18_s16 }
   0x3   :  { %p4176_p1 = scmp.lt.u32.totalorder %s4172_s19, %s4956_s1 }
   0x5   :  { %p4178_p2 = pnand %p4176_p1, %p4173_p0 }
   0x7   :  { %4181 = shalt.err (!%p4178_p2)
}
   0x8   :  { %s4182_s24 = scalar_lea.vmem %s19_s16, 8192  ;;  %p4187_p4 = scmp.lt.s32.totalorder %s19_s16, %s19_s16 }
   0x9   :  { %p4183_p3 = scmp.ne.s32.totalorder %s19_s16, %s4182_s24  ;;  %p4188_p5 = scmp.lt.s32.totalorder %s4182_s24, %s4182_s24 }
   0xb   :  { %p4189_p6 = por %p4188_p5, %p4187_p4 }
   0xd   :  { %p4190_p7 = pnand %p4189_p6, %p4183_p3 }
   0xf   :  { %4193 = shalt.err (!%p4190_p7)
}
  0x10   :  { %s4221_s25 = smov 512   ;;  %s4222_s26 = smov 32  }
  0x11   :  { %24 = dma.hbm_to_vmem [thread:$0]  %s4956_s1, 8192, %s19_s16, [#allocation3], %s4221_s25, %s4221_s25, %s4222_s26  }
  0x12   :  { %s4223_s29 = smov [#allocation4]   ;;  %s4194_s7 = scalar_lea.hbm %s4957_s2, 13312 }
  0x13   :  { %s30_s30 = sshll.u32 %s4223_s29, 4  ;;  %p4195_p8 = scmp.ne.s32.totalorder %s4957_s2, %s4194_s7  ;;  %s31_s30 = int_to_ptr.vmem [resolvable:$true] %s30_s30 }
  0x14   :  { %p4198_p9 = scmp.lt.u32.totalorder %s4194_s7, %s4957_s2 }
  0x16   :  { %p4200_p10 = pnand %p4198_p9, %p4195_p8 }
  0x18   :  { %4203 = shalt.err (!%p4200_p10)
}
  0x19   :  { %s4204_s12 = scalar_lea.vmem %s31_s30, 13312  ;;  %p4209_p12 = scmp.lt.s32.totalorder %s31_s30, %s31_s30 }
  0x1a   :  { %p4205_p11 = scmp.ne.s32.totalorder %s31_s30, %s4204_s12  ;;  %p4210_p13 = scmp.lt.s32.totalorder %s4204_s12, %s4204_s12 }
  0x1c   :  { %p4211_p0 = por %p4210_p13, %p4209_p12 }
  0x1e   :  { %p4212_p1 = pnand %p4211_p0, %p4205_p11 }
  0x20   :  { %4215 = shalt.err (!%p4212_p1)
}
  0x21   :  { %s4224_s1 = smov 64   ;;  %s4225_s13 = smov 4  }
  0x22   :  { %36 = dma.hbm_to_vmem [thread:$0]  %s4957_s2, 13312, %s31_s30, [#allocation5], %s4224_s1, %s4224_s1, %s4225_s13  }
  0x23   :  { %4216 = dma.done.wait [#allocation3], 8192  }
  0x24   :  { %4217 = vsyncadd [#allocation3], 4294959104 }
  0x25   :  { %4218 = dma.done.wait [#allocation5], 13312  }
  0x26   :  { %4219 = vsyncadd [#allocation5], 4294953984  ;;  %v4226_v0 = vmov 0   ;;  %v49_v1 = vld [vmem:[#allocation2] sm:$0xff]  ;;  %v50_v14 = vld [vmem:[#allocation2 + $0x8] sm:$0xff]  ;;  %vm4228_vm0 = vmmov 0  }
  0x27   :  { %465 = vmatprep.mubr.bf16.mxu0 %v4226_v0  ;;  %506 = vmatprep.mubr.bf16.mxu1 %v4226_v0  ;;  %v53_v2 = vld [vmem:[#allocation2 + $0x20] sm:$0xff]  ;;  %v54_v15 = vld [vmem:[#allocation2 + $0x28] sm:$0xff]  ;;  %v51_v56 = vld [vmem:[#allocation2 + $0x10] sm:$0xff]  ;;  %vm2821_vm2 = vcmask 1041408  }
  0x28   :  { %v57_v3 = vld [vmem:[#allocation2 + $0x40] sm:$0xff]  ;;  %v2846_v4 = vcombine.high %v49_v1, %v53_v2  ;;  %v2845_v5 = vcombine.low %v49_v1, %v53_v2  ;;  %v58_v16 = vld [vmem:[#allocation2 + $0x48] sm:$0xff]  ;;  %v2848_v18 = vcombine.high %v50_v14, %v54_v15  ;;  %v2847_v19 = vcombine.low %v50_v14, %v54_v15  ;;  %v55_v57 = vld [vmem:[#allocation2 + $0x30] sm:$0xff] }
  0x29   :  { %v61_v6 = vld [vmem:[#allocation2 + $0x60] sm:$0xff]  ;;  %v62_v17 = vld [vmem:[#allocation2 + $0x68] sm:$0xff]  ;;  %v59_v2 = vld [vmem:[#allocation2 + $0x50] sm:$0xff] }
  0x2a   :  { %v2854_v7 = vcombine.high %v57_v3, %v61_v6  ;;  %v65_v8 = vld [vmem:[#allocation2 + $0x80] sm:$0xff]  ;;  %433 = vmatprep.subr.bf16.mxu0 %v2846_v4  ;;  %v2853_v10 = vcombine.low %v57_v3, %v61_v6  ;;  %v2856_v20 = vcombine.high %v58_v16, %v62_v17  ;;  %v66_v22 = vld [vmem:[#allocation2 + $0x88] sm:$0xff]  ;;  %474 = vmatprep.subr.bf16.mxu1 %v2848_v18  ;;  %v63_v3 = vld [vmem:[#allocation2 + $0x70] sm:$0xff] }
  0x2b   :  { %v69_v9 = vld [vmem:[#allocation2 + $0xa0] sm:$0xff]  ;;  %434 = vmatpush1.bf16.msra.mxu0 %v2845_v5  ;;  %v70_v23 = vld [vmem:[#allocation2 + $0xa8] sm:$0xff]  ;;  %475 = vmatpush1.bf16.msra.mxu1 %v2847_v19  ;;  %v2855_v27 = vcombine.low %v58_v16, %v62_v17  ;;  %v2850_v4 = vcombine.high %v51_v56, %v55_v57  ;;  %v75_v14 = vld [vmem:[#allocation2 + $0xd0] sm:$0xff] }
  0x2c   :  { %435 = vmatprep.subr.bf16.mxu0 %v2854_v7  ;;  %v2862_v11 = vcombine.high %v65_v8, %v69_v9  ;;  %v73_v12 = vld [vmem:[#allocation2 + $0xc0] sm:$0xff]  ;;  %v2861_v21 = vcombine.low %v65_v8, %v69_v9  ;;  %476 = vmatprep.subr.bf16.mxu1 %v2856_v20  ;;  %v2864_v28 = vcombine.high %v66_v22, %v70_v23  ;;  %v74_v30 = vld [vmem:[#allocation2 + $0xc8] sm:$0xff]  ;;  %v67_v9 = vld [vmem:[#allocation2 + $0x90] sm:$0xff] }
  0x2d   :  { %v77_v13 = vld [vmem:[#allocation2 + $0xe0] sm:$0xff]  ;;  %v78_v31 = vld [vmem:[#allocation2 + $0xe8] sm:$0xff]  ;;  %v2863_v35 = vcombine.low %v66_v22, %v70_v23  ;;  %v2849_v8 = vcombine.low %v51_v56, %v55_v57  ;;  %v79_v15 = vld [vmem:[#allocation2 + $0xf0] sm:$0xff] }
  0x2e   :  { %v2870_v24 = vcombine.high %v73_v12, %v77_v13  ;;  %v81_v25 = vld [vmem:[#allocation2 + $0x100] sm:$0xff]  ;;  %v2869_v29 = vcombine.low %v73_v12, %v77_v13  ;;  %v2872_v36 = vcombine.high %v74_v30, %v78_v31  ;;  %v82_v37 = vld [vmem:[#allocation2 + $0x108] sm:$0xff]  ;;  %v2871_v43 = vcombine.low %v74_v30, %v78_v31  ;;  %v83_v18 = vld [vmem:[#allocation2 + $0x110] sm:$0xff] }
  0x2f   :  { %436 = vmatpush1.bf16.msra.mxu0 %v2853_v10  ;;  %v85_v26 = vld [vmem:[#allocation2 + $0x120] sm:$0xff]  ;;  %477 = vmatpush1.bf16.msra.mxu1 %v2855_v27  ;;  %v86_v39 = vld [vmem:[#allocation2 + $0x128] sm:$0xff]  ;;  %v71_v10 = vld [vmem:[#allocation2 + $0xb0] sm:$0xff]  ;;  %v2857_v13 = vcombine.low %v59_v2, %v63_v3  ;;  %v2874_v20 = vcombine.high %v75_v14, %v79_v15 }
  0x30   :  { %437 = vmatprep.subr.bf16.mxu0 %v2862_v11  ;;  %v2878_v32 = vcombine.high %v81_v25, %v85_v26  ;;  %v89_v33 = vld [vmem:[#allocation2 + $0x140] sm:$0xff]  ;;  %478 = vmatprep.subr.bf16.mxu1 %v2864_v28  ;;  %v2877_v38 = vcombine.low %v81_v25, %v85_v26  ;;  %v2880_v44 = vcombine.high %v82_v37, %v86_v39  ;;  %v90_v45 = vld [vmem:[#allocation2 + $0x148] sm:$0xff]  ;;  %v87_v19 = vld [vmem:[#allocation2 + $0x130] sm:$0xff] }
  0x31   :  { %v93_v34 = vld [vmem:[#allocation2 + $0x160] sm:$0xff]  ;;  %v94_v47 = vld [vmem:[#allocation2 + $0x168] sm:$0xff]  ;;  %v2879_v51 = vcombine.low %v82_v37, %v86_v39  ;;  %v2858_v11 = vcombine.high %v59_v2, %v63_v3  ;;  %v2866_v16 = vcombine.high %v67_v9, %v71_v10  ;;  %v2865_v17 = vcombine.low %v67_v9, %v71_v10  ;;  %v91_v22 = vld [vmem:[#allocation2 + $0x150] sm:$0xff] }
  0x32   :  { %v2886_v40 = vcombine.high %v89_v33, %v93_v34  ;;  %v97_v41 = vld [vmem:[#allocation2 + $0x180] sm:$0xff]  ;;  %v2885_v46 = vcombine.low %v89_v33, %v93_v34  ;;  %v2888_v52 = vcombine.high %v90_v45, %v94_v47  ;;  %v98_v53 = vld [vmem:[#allocation2 + $0x188] sm:$0xff]  ;;  %v2887_v60 = vcombine.low %v90_v45, %v94_v47  ;;  %v95_v23 = vld [vmem:[#allocation2 + $0x170] sm:$0xff] }
  0x33   :  { %438 = vmatpush1.bf16.msra.mxu0 %v2861_v21  ;;  %v101_v42 = vld [vmem:[#allocation2 + $0x1a0] sm:$0xff]  ;;  %479 = vmatpush1.bf16.msra.mxu1 %v2863_v35  ;;  %v102_v54 = vld [vmem:[#allocation2 + $0x1a8] sm:$0xff]  ;;  %v2873_v21 = vcombine.low %v75_v14, %v79_v15  ;;  %v2881_v25 = vcombine.low %v83_v18, %v87_v19  ;;  %v99_v26 = vld [vmem:[#allocation2 + $0x190] sm:$0xff]  ;;  %v2890_v28 = vcombine.high %v91_v22, %v95_v23  ;;  %v597_v14 = vlaneseq }
  0x34   :  { %439 = vmatprep.subr.bf16.mxu0 %v2870_v24  ;;  %480 = vmatprep.subr.bf16.mxu1 %v2872_v36  ;;  %v2894_v48 = vcombine.high %v97_v41, %v101_v42  ;;  %v105_v49 = vld [vmem:[#allocation2 + $0x1c0] sm:$0xff]  ;;  %v2893_v55 = vcombine.low %v97_v41, %v101_v42  ;;  %v106_v61 = vld [vmem:[#allocation2 + $0x1c8] sm:$0xff]  ;;  %v2896_v63 = vcombine.high %v98_v53, %v102_v54  ;;  %v103_v27 = vld [vmem:[#allocation2 + $0x1b0] sm:$0xff]  ;;  %v4227_v36 = vmov 0.0  }
  0x35   :  { %v109_v50 = vld [vmem:[#allocation2 + $0x1e0] sm:$0xff]  ;;  %v110_v62 = vld [vmem:[#allocation2 + $0x1e8] sm:$0xff]  ;;  %v2895_v5 = vcombine.low %v98_v53, %v102_v54  ;;  %v2882_v24 = vcombine.high %v83_v18, %v87_v19  ;;  %v107_v30 = vld [vmem:[#allocation2 + $0x1d0] sm:$0xff]  ;;  %v4330_v15 = vshrl.u32 %v597_v14, 7 }
  0x36   :  { %v2902_v58 = vcombine.high %v105_v49, %v109_v50  ;;  %v47_v59 = vld [vmem:[%s4955_s0] sm:$0x3]  ;;  %v2901_v1 = vcombine.low %v105_v49, %v109_v50  ;;  %v2904_v7 = vcombine.high %v106_v61, %v110_v62  ;;  %v2903_v12 = vcombine.low %v106_v61, %v110_v62  ;;  %v111_v31 = vld [vmem:[#allocation2 + $0x1f0] sm:$0xff]  ;;  %v4292_v37 = vld [vmem:[#allocation4 + $0x48] sm:$0xff]  }
  0x37   :  { %440 = vmatpush1.bf16.msra.mxu0 %v2869_v29  ;;  %481 = vmatpush1.bf16.msra.mxu1 %v2871_v43  ;;  %v4283_v6 = vpack.c.bf16 %v47_v59, %v47_v59  ;;  %v2889_v29 = vcombine.low %v91_v22, %v95_v23  ;;  %v2906_v33 = vcombine.high %v107_v30, %v111_v31  ;;  %v4289_v35 = vld [vmem:[#allocation4 + $0x40] sm:$0xff]   ;;  %v4301_v39 = vld [vmem:[#allocation4 + $0x58] sm:$0xff]   ;;  %v4309_v41 = vld [vmem:[#allocation4 + $0x68] sm:$0xff]  }
  0x38   :  { %441 = vmatprep.subr.bf16.mxu0 %v2878_v32  ;;  %482 = vmatprep.subr.bf16.mxu1 %v2880_v44  ;;  %v2898_v32 = vcombine.high %v99_v26, %v103_v27  ;;  %v2905_v34 = vcombine.low %v107_v30, %v111_v31  ;;  %v4314_v42 = vld [vmem:[#allocation4 + $0x70] sm:$0xff]   ;;  %v4319_v43 = vld [vmem:[#allocation4 + $0x78] sm:$0xff]  }
  0x39   :  { %v52_v44 = vld [vmem:[#allocation2 + $0x18] sm:$0xff]  ;;  %v4358_v31 = vld [vmem:[#allocation4 + $0x90] sm:$0xff]  }
  0x3a   :  { %v56_v45 = vld [vmem:[#allocation2 + $0x38] sm:$0xff] }
  0x3b   :  { %442 = vmatpush1.bf16.msra.mxu0 %v2877_v38  ;;  %483 = vmatpush1.bf16.msra.mxu1 %v2879_v51  ;;  %v4297_v38 = vld [vmem:[#allocation4 + $0x50] sm:$0xff]   ;;  %v2851_v47 = vcombine.low %v52_v44, %v56_v45  ;;  %v64_v49 = vld [vmem:[#allocation2 + $0x78] sm:$0xff] }
  0x3c   :  { %443 = vmatprep.subr.bf16.mxu0 %v2886_v40  ;;  %484 = vmatprep.subr.bf16.mxu1 %v2888_v52  ;;  %v4305_v40 = vld [vmem:[#allocation4 + $0x60] sm:$0xff]   ;;  %v68_v52 = vld [vmem:[#allocation2 + $0x98] sm:$0xff] }
  0x3d   :  { %v72_v53 = vld [vmem:[#allocation2 + $0xb8] sm:$0xff] }
  0x3e   :  { %v2868_v54 = vcombine.high %v68_v52, %v72_v53  ;;  %v76_v56 = vld [vmem:[#allocation2 + $0xd8] sm:$0xff] }
  0x3f   :  { %444 = vmatpush1.bf16.msra.mxu0 %v2885_v46  ;;  %485 = vmatpush1.bf16.msra.mxu1 %v2887_v60  ;;  %v2852_v46 = vcombine.high %v52_v44, %v56_v45  ;;  %v80_v57 = vld [vmem:[#allocation2 + $0xf8] sm:$0xff] }
  0x40   :  { %445 = vmatprep.subr.bf16.mxu0 %v2894_v48  ;;  %486 = vmatprep.subr.bf16.mxu1 %v2896_v63  ;;  %v60_v48 = vld [vmem:[#allocation2 + $0x58] sm:$0xff]  ;;  %v2875_v59 = vcombine.low %v76_v56, %v80_v57 }
  0x41   :  { %v2860_v50 = vcombine.high %v60_v48, %v64_v49  ;;  %v2859_v51 = vcombine.low %v60_v48, %v64_v49  ;;  %v84_v60 = vld [vmem:[#allocation2 + $0x118] sm:$0xff]  ;;  %v4390_v49 = vld [vmem:[#allocation4 + $0x8] sm:$0xff]  }
  0x42   :  { %v88_v61 = vld [vmem:[#allocation2 + $0x138] sm:$0xff] }
  0x43   :  { %446 = vmatpush1.bf16.msra.mxu0 %v2893_v55  ;;  %487 = vmatpush1.bf16.msra.mxu1 %v2895_v5  ;;  %v2867_v55 = vcombine.low %v68_v52, %v72_v53  ;;  %v2884_v62 = vcombine.high %v84_v60, %v88_v61  ;;  %v2883_v63 = vcombine.low %v84_v60, %v88_v61  ;;  %v96_v2 = vld [vmem:[#allocation2 + $0x178] sm:$0xff]  ;;  %v4404_v52 = vld [vmem:[#allocation4 + $0x20] sm:$0xff]  }
  0x44   :  { %447 = vmatprep.subr.bf16.mxu0 %v2902_v58  ;;  %488 = vmatprep.subr.bf16.mxu1 %v2904_v7  ;;  %v2876_v58 = vcombine.high %v76_v56, %v80_v57  ;;  %v100_v5 = vld [vmem:[#allocation2 + $0x198] sm:$0xff] }
  0x45   :  { %v104_v7 = vld [vmem:[#allocation2 + $0x1b8] sm:$0xff] }
  0x46   :  { %v2899_v9 = vcombine.low %v100_v5, %v104_v7  ;;  %v108_v10 = vld [vmem:[#allocation2 + $0x1d8] sm:$0xff] }
  0x47   :  { %448 = vmatpush1.bf16.msra.mxu0 %v2901_v1  ;;  %489 = vmatpush1.bf16.msra.mxu1 %v2903_v12  ;;  %v92_v1 = vld [vmem:[#allocation2 + $0x158] sm:$0xff] }
  0x48   :  { %515 = vmatprep.subr.bf16.mxu0 %v2850_v4  ;;  %556 = vmatprep.subr.bf16.mxu1 %v2852_v46  ;;  %v2892_v3 = vcombine.high %v92_v1, %v96_v2  ;;  %v2891_v4 = vcombine.low %v92_v1, %v96_v2  ;;  %v4379_v45 = vld [vmem:[#allocation4 + $0xb8] sm:$0xff]   ;;  %v4068_v1 = vld [vmem:[#allocation4 + $0xc8] sm:$0xff]   ;;  %v4069_v2 = vld [vmem:[#allocation4 + $0xd0] sm:$0xff]  }
  0x4a   :  { %466 = vmatmul.mubr.bf16.vlgmr.msra.gmra.mrb[0].mxu0 %v4283_v6  ;;  %507 = vmatmul.mubr.bf16.vlgmr.msra.gmra.mrb[0].mxu1 %v4283_v6 }
  0x4b   :  { %516 = vmatpush1.bf16.msra.mxu0 %v2849_v8  ;;  %547 = vmatprep.mubr.bf16.mxu0 %v4226_v0  ;;  %v2900_v8 = vcombine.high %v100_v5, %v104_v7  ;;  %v4072_v5 = vld [vmem:[#allocation4 + $0xe8] sm:$0xff]   ;;  %v4073_v7 = vld [vmem:[#allocation4 + $0xf0] sm:$0xff]  }
  0x4c   :  { %517 = vmatprep.subr.bf16.mxu0 %v2858_v11  ;;  %588 = vmatprep.mubr.bf16.mxu1 %v4226_v0  ;;  %v2897_v0 = vcombine.low %v99_v26, %v103_v27  ;;  %v112_v11 = vld [vmem:[#allocation2 + $0x1f8] sm:$0xff] }
  0x4d   :  { %557 = vmatpush1.bf16.msra.mxu1 %v2851_v47  ;;  %v2908_v12 = vcombine.high %v108_v10, %v112_v11  ;;  %v4383_v47 = vld [vmem:[#allocation4] sm:$0xff]  }
  0x4e   :  { %558 = vmatprep.subr.bf16.mxu1 %v2860_v50  ;;  %v4396_v50 = vld [vmem:[#allocation4 + $0x10] sm:$0xff]  }
  0x4f   :  { %518 = vmatpush1.bf16.msra.mxu0 %v2857_v13  ;;  %v2907_v13 = vcombine.low %v108_v10, %v112_v11 }
  0x50   :  { %519 = vmatprep.subr.bf16.mxu0 %v2866_v16  ;;  %v599_v16 = vsub.s32 0, %v4330_v15 }
  0x51   :  { %559 = vmatpush1.bf16.msra.mxu1 %v2859_v51  ;;  %v4400_v51 = vld [vmem:[#allocation4 + $0x18] sm:$0xff]  }
  0x52   :  { %560 = vmatprep.subr.bf16.mxu1 %v2868_v54  ;;  %v4410_v54 = vld [vmem:[#allocation4 + $0x28] sm:$0xff]  }
  0x53   :  { %520 = vmatpush1.bf16.msra.mxu0 %v2865_v17  ;;  %v4336_v17 = vld [vmem:[%s4958_s3] sm:$0xff] }
  0x54   :  { %521 = vmatprep.subr.bf16.mxu0 %v2874_v20  ;;  %v4339_v18 = vrot.slane %v4336_v17, %v599_v16 }
  0x55   :  { %561 = vmatpush1.bf16.msra.mxu1 %v2867_v55 }
  0x56   :  { %562 = vmatprep.subr.bf16.mxu1 %v2876_v58  ;;  %v4416_v58 = vld [vmem:[#allocation4 + $0x30] sm:$0xff]  }
  0x57   :  { %522 = vmatpush1.bf16.msra.mxu0 %v2873_v21 }
  0x58   :  { %523 = vmatprep.subr.bf16.mxu0 %v2882_v24  ;;  %v4342_v24 = vld [vmem:[#allocation4 + $0x80] sm:$0xff]  }
  0x59   :  { %563 = vmatpush1.bf16.msra.mxu1 %v2875_v59  ;;  %v4420_v59 = vld [vmem:[#allocation4 + $0x38] sm:$0xff]  }
  0x5a   :  { %564 = vmatprep.subr.bf16.mxu1 %v2884_v62  ;;  %v4067_v62 = vld [vmem:[#allocation4 + $0xc0] sm:$0xff]  }
  0x5b   :  { %524 = vmatpush1.bf16.msra.mxu0 %v2881_v25 }
  0x5c   :  { %525 = vmatprep.subr.bf16.mxu0 %v2890_v28  ;;  %v4352_v28 = vld [vmem:[#allocation4 + $0x88] sm:$0xff]  }
  0x5d   :  { %565 = vmatpush1.bf16.msra.mxu1 %v2883_v63 }
  0x5e   :  { %566 = vmatprep.subr.bf16.mxu1 %v2892_v3  ;;  %v4070_v3 = vld [vmem:[#allocation4 + $0xd8] sm:$0xff]  }
  0x5f   :  { %526 = vmatpush1.bf16.msra.mxu0 %v2889_v29 }
  0x60   :  { %527 = vmatprep.subr.bf16.mxu0 %v2898_v32  ;;  %v4362_v32 = vld [vmem:[#allocation4 + $0x98] sm:$0xff]  }
  0x61   :  { %567 = vmatpush1.bf16.msra.mxu1 %v2891_v4  ;;  %v4071_v4 = vld [vmem:[#allocation4 + $0xe0] sm:$0xff]  }
  0x62   :  { %568 = vmatprep.subr.bf16.mxu1 %v2900_v8 }
  0x63   :  { %528 = vmatpush1.bf16.msra.mxu0 %v2897_v0  ;;  %v4366_v0 = vld [vmem:[#allocation4 + $0xa0] sm:$0xff]  }
  0x64   :  { %529 = vmatprep.subr.bf16.mxu0 %v2906_v33  ;;  %v4370_v33 = vld [vmem:[#allocation4 + $0xa8] sm:$0xff]  }
  0x65   :  { %569 = vmatpush1.bf16.msra.mxu1 %v2899_v9  ;;  %v4074_v9 = vld [vmem:[#allocation4 + $0xf8] sm:$0xff]  }
  0x66   :  { %570 = vmatprep.subr.bf16.mxu1 %v2908_v12 }
  0x67   :  { %530 = vmatpush1.bf16.msra.mxu0 %v2905_v34  ;;  %v4374_v34 = vld [vmem:[#allocation4 + $0xb0] sm:$0xff]  }
  0x68   :  { %3301 = vmatprep.subr.bf16.mxu0 %v4227_v36 }
  0x69   :  { %571 = vmatpush1.bf16.msra.mxu1 %v2907_v13 }
  0x6a   :  { %548 = vmatmul.mubr.bf16.vlgmr.msra.gmra.mrb[4].mxu0 %v4283_v6  ;;  %3341 = vmatprep.subr.bf16.mxu1 %v4227_v36 }
  0x6b   :  { %3302 = vmatpush3.bf16.msra.mxu0 %v4289_v35  ;;  %3317 = vmatprep.mubr.msk.bf16.mxu0 %vm4228_vm0, %v4227_v36 }
  0x6c   :  { %3303 = vmatprep.subr.bf16.mxu0 %v4227_v36  ;;  %589 = vmatmul.mubr.bf16.vlgmr.msra.gmra.mrb[4].mxu1 %v4283_v6 }
  0x6d   :  { %3357 = vmatprep.mubr.msk.bf16.mxu1 %vm4228_vm0, %v4227_v36  ;;  %3342 = vmatpush3.bf16.msra.mxu1 %v4067_v62 }
  0x6e   :  { %3343 = vmatprep.subr.bf16.mxu1 %v4227_v36 }
  0x6f   :  { %3304 = vmatpush3.bf16.msra.mxu0 %v4292_v37 }
  0x70   :  { %3305 = vmatprep.subr.bf16.mxu0 %v4227_v36 }
  0x71   :  { %3344 = vmatpush3.bf16.msra.mxu1 %v4068_v1  ;;  %v4075_v1 = vld [vmem:[#allocation4 + $0x100] sm:$0xff]  }
  0x72   :  { %3345 = vmatprep.subr.bf16.mxu1 %v4227_v36 }
  0x73   :  { %3306 = vmatpush3.bf16.msra.mxu0 %v4297_v38 }
  0x74   :  { %3307 = vmatprep.subr.bf16.mxu0 %v4227_v36 }
  0x75   :  { %3346 = vmatpush3.bf16.msra.mxu1 %v4069_v2  ;;  %v4696_v2 = vld [vmem:[#allocation4 + $0x40] sm:$0xff]  }
  0x76   :  { %3347 = vmatprep.subr.bf16.mxu1 %v4227_v36 }
  0x77   :  { %3308 = vmatpush3.bf16.msra.mxu0 %v4301_v39 }
  0x78   :  { %3309 = vmatprep.subr.bf16.mxu0 %v4227_v36 }
  0x79   :  { %3348 = vmatpush3.bf16.msra.mxu1 %v4070_v3 }
  0x7a   :  { %3349 = vmatprep.subr.bf16.mxu1 %v4227_v36 }
  0x7b   :  { %3310 = vmatpush3.bf16.msra.mxu0 %v4305_v40 }
  0x7c   :  { %3311 = vmatprep.subr.bf16.mxu0 %v4227_v36 }
  0x7d   :  { %3350 = vmatpush3.bf16.msra.mxu1 %v4071_v4 }
  0x7e   :  { %3351 = vmatprep.subr.bf16.mxu1 %v4227_v36 }
  0x7f   :  { %3312 = vmatpush3.bf16.msra.mxu0 %v4309_v41 }
  0x80   :  { %3313 = vmatprep.subr.bf16.mxu0 %v4227_v36 }
  0x81   :  { %3352 = vmatpush3.bf16.msra.mxu1 %v4072_v5 }
  0x82   :  { %3353 = vmatprep.subr.bf16.mxu1 %v4227_v36 }
  0x83   :  { %3314 = vmatpush3.bf16.msra.mxu0 %v4314_v42 }
  0x84   :  { %3315 = vmatprep.subr.bf16.mxu0 %v4227_v36 }
  0x85   :  { %3354 = vmatpush3.bf16.msra.mxu1 %v4073_v7 }
  0x86   :  { %3355 = vmatprep.subr.bf16.mxu1 %v4227_v36 }
  0x87   :  { %3316 = vmatpush3.bf16.msra.mxu0 %v4319_v43 }
  0x88   :  { %3321 = vmatprep.subr.bf16.mxu0 %v4227_v36 }
  0x89   :  { %3356 = vmatpush3.bf16.msra.mxu1 %v4074_v9 }
  0x8a   :  { %3361 = vmatprep.subr.bf16.mxu1 %v4227_v36 }
 0x11d   :  { %v467_v19 = vpop.f32.mrb[0].mxu0  ;;  %v4346_v26 = vpop.f32.mrb[0].mxu1 }
 0x11e   :  { %v601_v6 = vadd.f32 %v4339_v18, %v467_v19  ;;  %v469_v20 = vpop.f32.mrb[1].mxu0  ;;  %v4349_v27 = vpop.f32.mrb[1].mxu1  ;;  %v607_v60 = vadd.f32 %v4339_v18, %v4346_v26 }
 0x11f   :  { %v471_v21 = vpop.f32.mrb[2].mxu0  ;;  %v512_v29 = vpop.f32.mrb[2].mxu1  ;;  %v604_v44 = vadd.f32 %v4339_v18, %v469_v20  ;;  %v610_v8 = vadd.f32 %v4339_v18, %v4349_v27 }
 0x120   :  { %v602_v22 = vmax.f32 %v601_v6, 0.0  ;;  %v472_v23 = vpop.f32.mrb[3].mxu0  ;;  %v513_v30 = vpop.f32.mrb[3].mxu1  ;;  %v608_v61 = vmax.f32 %v607_v60, 0.0  ;;  %v682_v6 = vsub.s32 1, %v4330_v15 }
 0x121   :  { %v605_v46 = vmax.f32 %v604_v44, 0.0  ;;  %v611_v10 = vmax.f32 %v610_v8, 0.0 }
 0x122   :  { %v4344_v25 = vpack.c.bf16 %v602_v22, %v602_v22  ;;  %v4445_v63 = vpack.c.bf16 %v608_v61, %v608_v61  ;;  %v4555_v20 = vrot.slane %v4336_v17, %v682_v6 }
 0x123   :  { %v4385_v48 = vpack.c.bf16 %v605_v46, %v605_v46  ;;  %v4475_v11 = vpack.c.bf16 %v611_v10, %v611_v10 }
 0x124   :  { %3318 = vmatmul.mubr.bf16.vlgmr.msra.gmra.mrb[8].mxu0 %v4344_v25 }
 0x125   :  { %3322 = vmatpush3.bf16.msra.mxu0 %v4342_v24  ;;  %3337 = vmatprep.mubr.msk.bf16.mxu0 %vm4228_vm0, %v4227_v36 }
 0x126   :  { %3323 = vmatprep.subr.bf16.mxu0 %v4227_v36 }
 0x129   :  { %3324 = vmatpush3.bf16.msra.mxu0 %v4352_v28 }
 0x12a   :  { %3325 = vmatprep.subr.bf16.mxu0 %v4227_v36 }
 0x12d   :  { %3326 = vmatpush3.bf16.msra.mxu0 %v4358_v31 }
 0x12e   :  { %3327 = vmatprep.subr.bf16.mxu0 %v4227_v36 }
 0x131   :  { %3328 = vmatpush3.bf16.msra.mxu0 %v4362_v32 }
 0x132   :  { %3329 = vmatprep.subr.bf16.mxu0 %v4227_v36 }
 0x135   :  { %3330 = vmatpush3.bf16.msra.mxu0 %v4366_v0 }
 0x136   :  { %3331 = vmatprep.subr.bf16.mxu0 %v4227_v36 }
 0x139   :  { %3332 = vmatpush3.bf16.msra.mxu0 %v4370_v33 }
 0x13a   :  { %3333 = vmatprep.subr.bf16.mxu0 %v4227_v36 }
 0x13d   :  { %3334 = vmatpush3.bf16.msra.mxu0 %v4374_v34  ;;  %v4407_v53 = vpop.f32.mrb[4].mxu0 }
 0x13e   :  { %3335 = vmatprep.subr.bf16.mxu0 %v4227_v36  ;;  %v4412_v55 = vpop.f32.mrb[5].mxu0  ;;  %v613_v13 = vadd.f32 %v4339_v18, %v4407_v53 }
 0x13f   :  { %v553_v56 = vpop.f32.mrb[6].mxu0  ;;  %v4514_v12 = vpop.f32.mrb[4].mxu1  ;;  %v616_v17 = vadd.f32 %v4339_v18, %v4412_v55 }
 0x140   :  { %v554_v57 = vpop.f32.mrb[7].mxu0  ;;  %v614_v16 = vmax.f32 %v613_v13, 0.0  ;;  %v4599_v44 = vpop.f32.mrb[5].mxu1 }
 0x141   :  { %3336 = vmatpush3.bf16.msra.mxu0 %v4379_v45  ;;  %v594_v46 = vpop.f32.mrb[6].mxu1  ;;  %v617_v56 = vmax.f32 %v616_v17, 0.0  ;;  %v4087_v17 = vld [vmem:[#allocation4 + $0x160] sm:$0xff]  }
 0x142   :  { %3441 = vmatprep.subr.bf16.mxu0 %v4227_v36  ;;  %v4539_v19 = vpack.c.bf16 %v614_v16, %v614_v16  ;;  %v595_v53 = vpop.f32.mrb[7].mxu1  ;;  %v4089_v46 = vld [vmem:[#allocation4 + $0x170] sm:$0xff]  }
 0x143   :  { %v4611_v55 = vpack.c.bf16 %v617_v56, %v617_v56  ;;  %v4090_v56 = vld [vmem:[#allocation4 + $0x178] sm:$0xff]  }
 0x144   :  { %3338 = vmatmul.mubr.bf16.vlgmr.msra.gmra.mrb[8].mxu0 %v4385_v48 }
 0x145   :  { %3442 = vmatpush3.bf16.msra.mxu0 %v4383_v47  ;;  %3457 = vmatprep.mubr.msk.bf16.mxu0 %vm4228_vm0, %v4227_v36 }
 0x146   :  { %3443 = vmatprep.subr.bf16.mxu0 %v4227_v36 }
 0x149   :  { %3444 = vmatpush3.bf16.msra.mxu0 %v4390_v49 }
 0x14a   :  { %3445 = vmatprep.subr.bf16.mxu0 %v4227_v36 }
 0x14d   :  { %3446 = vmatpush3.bf16.msra.mxu0 %v4396_v50 }
 0x14e   :  { %3447 = vmatprep.subr.bf16.mxu0 %v4227_v36 }
 0x151   :  { %3448 = vmatpush3.bf16.msra.mxu0 %v4400_v51 }
 0x152   :  { %3449 = vmatprep.subr.bf16.mxu0 %v4227_v36 }
 0x155   :  { %3450 = vmatpush3.bf16.msra.mxu0 %v4404_v52 }
 0x156   :  { %3451 = vmatprep.subr.bf16.mxu0 %v4227_v36 }
 0x159   :  { %3452 = vmatpush3.bf16.msra.mxu0 %v4410_v54 }
 0x15a   :  { %3453 = vmatprep.subr.bf16.mxu0 %v4227_v36 }
 0x15d   :  { %3454 = vmatpush3.bf16.msra.mxu0 %v4416_v58 }
 0x15e   :  { %3455 = vmatprep.subr.bf16.mxu0 %v4227_v36 }
 0x161   :  { %3456 = vmatpush3.bf16.msra.mxu0 %v4420_v59 }
 0x162   :  { %3461 = vmatprep.subr.bf16.mxu0 %v4227_v36 }
 0x164   :  { %3458 = vmatmul.mubr.bf16.vlgmr.msra.gmra.mrb[12].mxu0 %v4385_v48 }
 0x165   :  { %3462 = vmatpush3.bf16.msra.mxu0 %v4289_v35  ;;  %3477 = vmatprep.mubr.msk.bf16.mxu0 %vm4228_vm0, %v4227_v36 }
 0x166   :  { %3463 = vmatprep.subr.bf16.mxu0 %v4227_v36 }
 0x169   :  { %3464 = vmatpush3.bf16.msra.mxu0 %v4292_v37 }
 0x16a   :  { %3465 = vmatprep.subr.bf16.mxu0 %v4227_v36 }
 0x16d   :  { %3466 = vmatpush3.bf16.msra.mxu0 %v4297_v38 }
 0x16e   :  { %3467 = vmatprep.subr.bf16.mxu0 %v4227_v36 }
 0x171   :  { %3468 = vmatpush3.bf16.msra.mxu0 %v4301_v39 }
 0x172   :  { %3469 = vmatprep.subr.bf16.mxu0 %v4227_v36 }
 0x175   :  { %3470 = vmatpush3.bf16.msra.mxu0 %v4305_v40 }
 0x176   :  { %3471 = vmatprep.subr.bf16.mxu0 %v4227_v36 }
 0x179   :  { %3472 = vmatpush3.bf16.msra.mxu0 %v4309_v41 }
 0x17a   :  { %3473 = vmatprep.subr.bf16.mxu0 %v4227_v36 }
 0x17d   :  { %3474 = vmatpush3.bf16.msra.mxu0 %v4314_v42 }
 0x17e   :  { %3475 = vmatprep.subr.bf16.mxu0 %v4227_v36 }
 0x181   :  { %3476 = vmatpush3.bf16.msra.mxu0 %v4319_v43 }
 0x182   :  { %3481 = vmatprep.subr.bf16.mxu0 %v4227_v36 }
 0x184   :  { %3478 = vmatmul.mubr.bf16.vlgmr.msra.gmra.mrb[12].mxu0 %v4445_v63 }
 0x185   :  { %3482 = vmatpush3.bf16.msra.mxu0 %v4342_v24  ;;  %3497 = vmatprep.mubr.msk.bf16.mxu0 %vm4228_vm0, %v4227_v36 }
 0x186   :  { %3483 = vmatprep.subr.bf16.mxu0 %v4227_v36 }
 0x189   :  { %3484 = vmatpush3.bf16.msra.mxu0 %v4352_v28 }
 0x18a   :  { %3485 = vmatprep.subr.bf16.mxu0 %v4227_v36 }
 0x18d   :  { %3486 = vmatpush3.bf16.msra.mxu0 %v4358_v31 }
 0x18e   :  { %3487 = vmatprep.subr.bf16.mxu0 %v4227_v36 }
 0x191   :  { %3488 = vmatpush3.bf16.msra.mxu0 %v4362_v32 }
 0x192   :  { %3489 = vmatprep.subr.bf16.mxu0 %v4227_v36 }
 0x195   :  { %3490 = vmatpush3.bf16.msra.mxu0 %v4366_v0 }
 0x196   :  { %3491 = vmatprep.subr.bf16.mxu0 %v4227_v36 }
 0x199   :  { %3492 = vmatpush3.bf16.msra.mxu0 %v4370_v33 }
 0x19a   :  { %3493 = vmatprep.subr.bf16.mxu0 %v4227_v36 }
 0x19d   :  { %3494 = vmatpush3.bf16.msra.mxu0 %v4374_v34 }
 0x19e   :  { %3495 = vmatprep.subr.bf16.mxu0 %v4227_v36 }
 0x1a1   :  { %3496 = vmatpush3.bf16.msra.mxu0 %v4379_v45 }
 0x1a2   :  { %3521 = vmatprep.subr.bf16.mxu0 %v4227_v36 }
 0x1a4   :  { %3498 = vmatmul.mubr.bf16.vlgmr.msra.gmra.mrb[12].mxu0 %v4475_v11 }
 0x1a5   :  { %3522 = vmatpush3.bf16.msra.mxu0 %v4383_v47  ;;  %3537 = vmatprep.mubr.msk.bf16.mxu0 %vm4228_vm0, %v4227_v36 }
 0x1a6   :  { %3523 = vmatprep.subr.bf16.mxu0 %v4227_v36 }
 0x1a9   :  { %3524 = vmatpush3.bf16.msra.mxu0 %v4390_v49 }
 0x1aa   :  { %3525 = vmatprep.subr.bf16.mxu0 %v4227_v36 }
 0x1ad   :  { %3526 = vmatpush3.bf16.msra.mxu0 %v4396_v50 }
 0x1ae   :  { %3527 = vmatprep.subr.bf16.mxu0 %v4227_v36 }
 0x1b1   :  { %3528 = vmatpush3.bf16.msra.mxu0 %v4400_v51 }
 0x1b2   :  { %3529 = vmatprep.subr.bf16.mxu0 %v4227_v36 }
 0x1b5   :  { %3530 = vmatpush3.bf16.msra.mxu0 %v4404_v52 }
 0x1b6   :  { %3531 = vmatprep.subr.bf16.mxu0 %v4227_v36 }
 0x1b9   :  { %3532 = vmatpush3.bf16.msra.mxu0 %v4410_v54 }
 0x1ba   :  { %3533 = vmatprep.subr.bf16.mxu0 %v4227_v36 }
 0x1bd   :  { %3534 = vmatpush3.bf16.msra.mxu0 %v4416_v58 }
 0x1be   :  { %3535 = vmatprep.subr.bf16.mxu0 %v4227_v36 }
 0x1c1   :  { %3536 = vmatpush3.bf16.msra.mxu0 %v4420_v59 }
 0x1c2   :  { %3541 = vmatprep.subr.bf16.mxu0 %v4227_v36 }
 0x1c4   :  { %3538 = vmatmul.mubr.bf16.vlgmr.msra.gmra.mrb[16].mxu0 %v4445_v63 }
 0x1c5   :  { %3542 = vmatpush3.bf16.msra.mxu0 %v4289_v35  ;;  %3557 = vmatprep.mubr.msk.bf16.mxu0 %vm4228_vm0, %v4227_v36 }
 0x1c6   :  { %3543 = vmatprep.subr.bf16.mxu0 %v4227_v36 }
 0x1c9   :  { %3544 = vmatpush3.bf16.msra.mxu0 %v4292_v37 }
 0x1ca   :  { %3545 = vmatprep.subr.bf16.mxu0 %v4227_v36 }
 0x1cd   :  { %3546 = vmatpush3.bf16.msra.mxu0 %v4297_v38 }
 0x1ce   :  { %3547 = vmatprep.subr.bf16.mxu0 %v4227_v36 }
 0x1d1   :  { %3548 = vmatpush3.bf16.msra.mxu0 %v4301_v39 }
 0x1d2   :  { %3549 = vmatprep.subr.bf16.mxu0 %v4227_v36 }
 0x1d5   :  { %3550 = vmatpush3.bf16.msra.mxu0 %v4305_v40 }
 0x1d6   :  { %3551 = vmatprep.subr.bf16.mxu0 %v4227_v36 }
 0x1d9   :  { %3552 = vmatpush3.bf16.msra.mxu0 %v4309_v41 }
 0x1da   :  { %3553 = vmatprep.subr.bf16.mxu0 %v4227_v36 }
 0x1dd   :  { %3554 = vmatpush3.bf16.msra.mxu0 %v4314_v42 }
 0x1de   :  { %3555 = vmatprep.subr.bf16.mxu0 %v4227_v36 }
 0x1e1   :  { %3556 = vmatpush3.bf16.msra.mxu0 %v4319_v43 }
 0x1e2   :  { %3561 = vmatprep.subr.bf16.mxu0 %v4227_v36 }
 0x1e4   :  { %3558 = vmatmul.mubr.bf16.vlgmr.msra.gmra.mrb[16].mxu0 %v4475_v11 }
 0x1e5   :  { %3562 = vmatpush3.bf16.msra.mxu0 %v4342_v24  ;;  %3577 = vmatprep.mubr.msk.bf16.mxu0 %vm4228_vm0, %v4227_v36 }
 0x1e6   :  { %3563 = vmatprep.subr.bf16.mxu0 %v4227_v36 }
 0x1e9   :  { %3564 = vmatpush3.bf16.msra.mxu0 %v4352_v28 }
 0x1ea   :  { %3565 = vmatprep.subr.bf16.mxu0 %v4227_v36 }
 0x1ed   :  { %3566 = vmatpush3.bf16.msra.mxu0 %v4358_v31 }
 0x1ee   :  { %3567 = vmatprep.subr.bf16.mxu0 %v4227_v36 }
 0x1f1   :  { %3568 = vmatpush3.bf16.msra.mxu0 %v4362_v32 }
 0x1f2   :  { %3569 = vmatprep.subr.bf16.mxu0 %v4227_v36 }
 0x1f5   :  { %3570 = vmatpush3.bf16.msra.mxu0 %v4366_v0 }
 0x1f6   :  { %3571 = vmatprep.subr.bf16.mxu0 %v4227_v36 }
 0x1f9   :  { %3572 = vmatpush3.bf16.msra.mxu0 %v4370_v33 }
 0x1fa   :  { %3573 = vmatprep.subr.bf16.mxu0 %v4227_v36 }
 0x1fd   :  { %3574 = vmatpush3.bf16.msra.mxu0 %v4374_v34 }
 0x1fe   :  { %3575 = vmatprep.subr.bf16.mxu0 %v4227_v36 }
 0x201   :  { %3576 = vmatpush3.bf16.msra.mxu0 %v4379_v45 }
 0x202   :  { %3681 = vmatprep.subr.bf16.mxu0 %v4227_v36 }
 0x204   :  { %3578 = vmatmul.mubr.bf16.vlgmr.msra.gmra.mrb[16].mxu0 %v4539_v19 }
 0x205   :  { %3682 = vmatpush3.bf16.msra.mxu0 %v4383_v47  ;;  %3697 = vmatprep.mubr.msk.bf16.mxu0 %vm4228_vm0, %v4227_v36 }
 0x206   :  { %3683 = vmatprep.subr.bf16.mxu0 %v4227_v36 }
 0x209   :  { %3684 = vmatpush3.bf16.msra.mxu0 %v4390_v49 }
 0x20a   :  { %3685 = vmatprep.subr.bf16.mxu0 %v4227_v36 }
 0x20d   :  { %3686 = vmatpush3.bf16.msra.mxu0 %v4396_v50 }
 0x20e   :  { %3687 = vmatprep.subr.bf16.mxu0 %v4227_v36 }
 0x211   :  { %3688 = vmatpush3.bf16.msra.mxu0 %v4400_v51 }
 0x212   :  { %3689 = vmatprep.subr.bf16.mxu0 %v4227_v36 }
 0x215   :  { %3690 = vmatpush3.bf16.msra.mxu0 %v4404_v52 }
 0x216   :  { %3691 = vmatprep.subr.bf16.mxu0 %v4227_v36 }
 0x217   :  { %v856_v21 = vpop.f32.mrb[8].mxu0 }
 0x218   :  { %v3941_v22 = vadd.f32 %v856_v21, %v4555_v20  ;;  %v3339_v23 = vpop.f32.mrb[9].mxu0 }
 0x219   :  { %v859_v26 = vpop.f32.mrb[10].mxu0  ;;  %3692 = vmatpush3.bf16.msra.mxu0 %v4410_v54  ;;  %v4083_v23 = vld [vmem:[#allocation4 + $0x140] sm:$0xff]  }
 0x21a   :  { %v863_v27 = vmax.f32 %v3941_v22, 0.0  ;;  %v3340_v29 = vpop.f32.mrb[11].mxu0  ;;  %3693 = vmatprep.subr.bf16.mxu0 %v4227_v36 }
 0x21b   :  { %v4085_v29 = vld [vmem:[#allocation4 + $0x150] sm:$0xff]  }
 0x21c   :  { %v864_v30 = vpack.c.bf16 %v863_v27, %v863_v27  ;;  %v4084_v27 = vld [vmem:[#allocation4 + $0x148] sm:$0xff]  }
 0x21d   :  { %3694 = vmatpush3.bf16.msra.mxu0 %v4416_v58 }
 0x21e   :  { %3358 = vmatmul.mubr.bf16.vlgmr.msra.gmra.mrb[8].mxu1 %v864_v30  ;;  %3695 = vmatprep.subr.bf16.mxu0 %v4227_v36  ;;  %v4086_v30 = vld [vmem:[#allocation4 + $0x158] sm:$0xff]  }
 0x21f   :  { %3362 = vmatpush3.bf16.msra.mxu1 %v4383_v47  ;;  %3377 = vmatprep.mubr.msk.bf16.mxu1 %vm4228_vm0, %v4227_v36 }
 0x220   :  { %3363 = vmatprep.subr.bf16.mxu1 %v4227_v36 }
 0x221   :  { %3696 = vmatpush3.bf16.msra.mxu0 %v4420_v59 }
 0x222   :  { %3701 = vmatprep.subr.bf16.mxu0 %v4227_v36 }
 0x223   :  { %3364 = vmatpush3.bf16.msra.mxu1 %v4390_v49 }
 0x224   :  { %3698 = vmatmul.mubr.bf16.vlgmr.msra.gmra.mrb[20].mxu0 %v4539_v19  ;;  %3365 = vmatprep.subr.bf16.mxu1 %v4227_v36 }
 0x225   :  { %3702 = vmatpush3.bf16.msra.mxu0 %v4289_v35  ;;  %3717 = vmatprep.mubr.msk.bf16.mxu0 %vm4228_vm0, %v4227_v36 }
 0x226   :  { %3703 = vmatprep.subr.bf16.mxu0 %v4227_v36 }
 0x227   :  { %3366 = vmatpush3.bf16.msra.mxu1 %v4396_v50 }
 0x228   :  { %3367 = vmatprep.subr.bf16.mxu1 %v4227_v36 }
 0x229   :  { %3704 = vmatpush3.bf16.msra.mxu0 %v4292_v37 }
 0x22a   :  { %3705 = vmatprep.subr.bf16.mxu0 %v4227_v36 }
 0x22b   :  { %3368 = vmatpush3.bf16.msra.mxu1 %v4400_v51 }
 0x22c   :  { %3369 = vmatprep.subr.bf16.mxu1 %v4227_v36 }
 0x22d   :  { %3706 = vmatpush3.bf16.msra.mxu0 %v4297_v38 }
 0x22e   :  { %3707 = vmatprep.subr.bf16.mxu0 %v4227_v36 }
 0x22f   :  { %3370 = vmatpush3.bf16.msra.mxu1 %v4404_v52 }
 0x230   :  { %3371 = vmatprep.subr.bf16.mxu1 %v4227_v36 }
 0x231   :  { %3708 = vmatpush3.bf16.msra.mxu0 %v4301_v39 }
 0x232   :  { %3709 = vmatprep.subr.bf16.mxu0 %v4227_v36 }
 0x233   :  { %3372 = vmatpush3.bf16.msra.mxu1 %v4410_v54 }
 0x234   :  { %3373 = vmatprep.subr.bf16.mxu1 %v4227_v36 }
 0x235   :  { %3710 = vmatpush3.bf16.msra.mxu0 %v4305_v40 }
 0x236   :  { %3711 = vmatprep.subr.bf16.mxu0 %v4227_v36 }
 0x237   :  { %3374 = vmatpush3.bf16.msra.mxu1 %v4416_v58 }
 0x238   :  { %3375 = vmatprep.subr.bf16.mxu1 %v4227_v36 }
 0x239   :  { %3712 = vmatpush3.bf16.msra.mxu0 %v4309_v41 }
 0x23a   :  { %3713 = vmatprep.subr.bf16.mxu0 %v4227_v36 }
 0x23b   :  { %3376 = vmatpush3.bf16.msra.mxu1 %v4420_v59 }
 0x23c   :  { %3381 = vmatprep.subr.bf16.mxu1 %v4227_v36 }
 0x23d   :  { %3714 = vmatpush3.bf16.msra.mxu0 %v4314_v42 }
 0x23e   :  { %3378 = vmatmul.mubr.bf16.vlgmr.msra.gmra.mrb[12].mxu1 %v4344_v25  ;;  %3715 = vmatprep.subr.bf16.mxu0 %v4227_v36 }
 0x23f   :  { %3382 = vmatpush3.bf16.msra.mxu1 %v4289_v35  ;;  %3397 = vmatprep.mubr.msk.bf16.mxu1 %vm4228_vm0, %v4227_v36  ;;  %v619_v35 = vadd.f32 %v4339_v18, %v4514_v12 }
 0x240   :  { %3383 = vmatprep.subr.bf16.mxu1 %v4227_v36 }
 0x241   :  { %3716 = vmatpush3.bf16.msra.mxu0 %v4319_v43  ;;  %v620_v25 = vmax.f32 %v619_v35, 0.0 }
 0x242   :  { %3721 = vmatprep.subr.bf16.mxu0 %v4227_v36 }
 0x243   :  { %3384 = vmatpush3.bf16.msra.mxu1 %v4292_v37  ;;  %v4651_v57 = vpack.c.bf16 %v620_v25, %v620_v25  ;;  %v4091_v25 = vld [vmem:[#allocation4 + $0x180] sm:$0xff]  }
 0x244   :  { %3718 = vmatmul.mubr.bf16.vlgmr.msra.gmra.mrb[20].mxu0 %v4611_v55  ;;  %3385 = vmatprep.subr.bf16.mxu1 %v4227_v36 }
 0x245   :  { %3722 = vmatpush3.bf16.msra.mxu0 %v4342_v24  ;;  %3737 = vmatprep.mubr.msk.bf16.mxu0 %vm4228_vm0, %v4227_v36 }
 0x246   :  { %3723 = vmatprep.subr.bf16.mxu0 %v4227_v36 }
 0x247   :  { %3386 = vmatpush3.bf16.msra.mxu1 %v4297_v38 }
 0x248   :  { %3387 = vmatprep.subr.bf16.mxu1 %v4227_v36 }
 0x249   :  { %3724 = vmatpush3.bf16.msra.mxu0 %v4352_v28 }
 0x24a   :  { %3725 = vmatprep.subr.bf16.mxu0 %v4227_v36 }
 0x24b   :  { %3388 = vmatpush3.bf16.msra.mxu1 %v4301_v39 }
 0x24c   :  { %3389 = vmatprep.subr.bf16.mxu1 %v4227_v36 }
 0x24d   :  { %3726 = vmatpush3.bf16.msra.mxu0 %v4358_v31 }
 0x24e   :  { %3727 = vmatprep.subr.bf16.mxu0 %v4227_v36 }
 0x24f   :  { %3390 = vmatpush3.bf16.msra.mxu1 %v4305_v40 }
 0x250   :  { %3391 = vmatprep.subr.bf16.mxu1 %v4227_v36 }
 0x251   :  { %3728 = vmatpush3.bf16.msra.mxu0 %v4362_v32 }
 0x252   :  { %3729 = vmatprep.subr.bf16.mxu0 %v4227_v36 }
 0x253   :  { %3392 = vmatpush3.bf16.msra.mxu1 %v4309_v41 }
 0x254   :  { %3393 = vmatprep.subr.bf16.mxu1 %v4227_v36 }
 0x255   :  { %3730 = vmatpush3.bf16.msra.mxu0 %v4366_v0 }
 0x256   :  { %3731 = vmatprep.subr.bf16.mxu0 %v4227_v36 }
 0x257   :  { %3394 = vmatpush3.bf16.msra.mxu1 %v4314_v42 }
 0x258   :  { %3395 = vmatprep.subr.bf16.mxu1 %v4227_v36 }
 0x259   :  { %3732 = vmatpush3.bf16.msra.mxu0 %v4370_v33 }
 0x25a   :  { %3733 = vmatprep.subr.bf16.mxu0 %v4227_v36 }
 0x25b   :  { %3396 = vmatpush3.bf16.msra.mxu1 %v4319_v43 }
 0x25c   :  { %3401 = vmatprep.subr.bf16.mxu1 %v4227_v36 }
 0x25d   :  { %3734 = vmatpush3.bf16.msra.mxu0 %v4374_v34 }
 0x25e   :  { %3398 = vmatmul.mubr.bf16.vlgmr.msra.gmra.mrb[12].mxu1 %v4385_v48  ;;  %3735 = vmatprep.subr.bf16.mxu0 %v4227_v36 }
 0x25f   :  { %3402 = vmatpush3.bf16.msra.mxu1 %v4342_v24  ;;  %3417 = vmatprep.mubr.msk.bf16.mxu1 %vm4228_vm0, %v4227_v36 }
 0x260   :  { %3403 = vmatprep.subr.bf16.mxu1 %v4227_v36 }
 0x261   :  { %3736 = vmatpush3.bf16.msra.mxu0 %v4379_v45 }
 0x262   :  { %3761 = vmatprep.subr.bf16.mxu0 %v4227_v36 }
 0x263   :  { %3404 = vmatpush3.bf16.msra.mxu1 %v4352_v28 }
 0x264   :  { %3738 = vmatmul.mubr.bf16.vlgmr.msra.gmra.mrb[20].mxu0 %v4651_v57  ;;  %3405 = vmatprep.subr.bf16.mxu1 %v4227_v36 }
 0x265   :  { %3762 = vmatpush3.bf16.msra.mxu0 %v4383_v47  ;;  %3777 = vmatprep.mubr.msk.bf16.mxu0 %vm4228_vm0, %v4227_v36 }
 0x266   :  { %3763 = vmatprep.subr.bf16.mxu0 %v4227_v36 }
 0x267   :  { %3406 = vmatpush3.bf16.msra.mxu1 %v4358_v31 }
 0x268   :  { %3407 = vmatprep.subr.bf16.mxu1 %v4227_v36 }
 0x269   :  { %3764 = vmatpush3.bf16.msra.mxu0 %v4390_v49 }
 0x26a   :  { %3765 = vmatprep.subr.bf16.mxu0 %v4227_v36 }
 0x26b   :  { %3408 = vmatpush3.bf16.msra.mxu1 %v4362_v32 }
 0x26c   :  { %3409 = vmatprep.subr.bf16.mxu1 %v4227_v36 }
 0x26d   :  { %3766 = vmatpush3.bf16.msra.mxu0 %v4396_v50 }
 0x26e   :  { %3767 = vmatprep.subr.bf16.mxu0 %v4227_v36 }
 0x26f   :  { %3410 = vmatpush3.bf16.msra.mxu1 %v4366_v0 }
 0x270   :  { %3411 = vmatprep.subr.bf16.mxu1 %v4227_v36 }
 0x271   :  { %3768 = vmatpush3.bf16.msra.mxu0 %v4400_v51 }
 0x272   :  { %3769 = vmatprep.subr.bf16.mxu0 %v4227_v36 }
 0x273   :  { %3412 = vmatpush3.bf16.msra.mxu1 %v4370_v33 }
 0x274   :  { %3413 = vmatprep.subr.bf16.mxu1 %v4227_v36 }
 0x275   :  { %3770 = vmatpush3.bf16.msra.mxu0 %v4404_v52 }
 0x276   :  { %3771 = vmatprep.subr.bf16.mxu0 %v4227_v36 }
 0x277   :  { %3414 = vmatpush3.bf16.msra.mxu1 %v4374_v34  ;;  %v4680_v48 = vpop.f32.mrb[12].mxu0 }
 0x278   :  { %v3499_v60 = vpop.f32.mrb[13].mxu0  ;;  %3415 = vmatprep.subr.bf16.mxu1 %v4227_v36  ;;  %v3944_v53 = vadd.f32 %v4680_v48, %v4555_v20  ;;  %v4093_v48 = vld [vmem:[#allocation4 + $0x190] sm:$0xff]  }
 0x279   :  { %v1369_v61 = vpop.f32.mrb[14].mxu0  ;;  %3772 = vmatpush3.bf16.msra.mxu0 %v4410_v54 }
 0x27a   :  { %v3500_v62 = vpop.f32.mrb[15].mxu0  ;;  %3773 = vmatprep.subr.bf16.mxu0 %v4227_v36  ;;  %v1373_v35 = vmax.f32 %v3944_v53, 0.0  ;;  %v4092_v61 = vld [vmem:[#allocation4 + $0x188] sm:$0xff]   ;;  %v4118_v53 = vld [vmem:[#allocation4 + $0x258] sm:$0xff]  }
 0x27b   :  { %3416 = vmatpush3.bf16.msra.mxu1 %v4379_v45  ;;  %v4094_v62 = vld [vmem:[#allocation4 + $0x198] sm:$0xff]  }
 0x27c   :  { %3421 = vmatprep.subr.bf16.mxu1 %v4227_v36  ;;  %v1374_v60 = vpack.c.bf16 %v1373_v35, %v1373_v35  ;;  %v4120_v35 = vld [vmem:[#allocation4 + $0x268] sm:$0xff]  }
 0x27d   :  { %3774 = vmatpush3.bf16.msra.mxu0 %v4416_v58 }
 0x27e   :  { %3418 = vmatmul.mubr.bf16.vlgmr.msra.gmra.mrb[12].mxu1 %v4445_v63  ;;  %3775 = vmatprep.subr.bf16.mxu0 %v4227_v36 }
 0x27f   :  { %3422 = vmatpush3.bf16.msra.mxu1 %v4075_v1  ;;  %3437 = vmatprep.mubr.msk.bf16.mxu1 %vm4228_vm0, %v4227_v36  ;;  %v4095_v1 = vld [vmem:[#allocation4 + $0x1a0] sm:$0xff]  }
 0x280   :  { %3423 = vmatprep.subr.bf16.mxu1 %v4227_v36 }
 0x281   :  { %3776 = vmatpush3.bf16.msra.mxu0 %v4420_v59 }
 0x282   :  { %3781 = vmatprep.subr.bf16.mxu0 %v4227_v36 }
 0x284   :  { %3778 = vmatmul.mubr.bf16.vlgmr.msra.gmra.mrb[24].mxu0 %v4611_v55 }
 0x285   :  { %3782 = vmatpush3.bf16.msra.mxu0 %v4696_v2  ;;  %3797 = vmatprep.mubr.msk.bf16.mxu0 %vm4228_vm0, %v4227_v36 }
 0x286   :  { %3783 = vmatprep.subr.bf16.mxu0 %v4227_v36 }
 0x289   :  { %3784 = vmatpush3.bf16.msra.mxu0 %v4292_v37  ;;  %v622_v37 = vadd.f32 %v4339_v18, %v4599_v44  ;;  %v4080_v18 = vld [vmem:[#allocation4 + $0x128] sm:$0xff]  }
 0x28a   :  { %3785 = vmatprep.subr.bf16.mxu0 %v4227_v36  ;;  %v4088_v44 = vld [vmem:[#allocation4 + $0x168] sm:$0xff]  }
 0x28d   :  { %3786 = vmatpush3.bf16.msra.mxu0 %v4297_v38  ;;  %v4076_v38 = vld [vmem:[#allocation4 + $0x108] sm:$0xff]  }
 0x28e   :  { %3787 = vmatprep.subr.bf16.mxu0 %v4227_v36  ;;  %3424 = vmatpush3.bf16.msra.mxu1 %v4076_v38  ;;  %v4097_v38 = vld [vmem:[#allocation4 + $0x1b0] sm:$0xff]  }
 0x28f   :  { %3425 = vmatprep.subr.bf16.mxu1 %v4227_v36 }
 0x291   :  { %3788 = vmatpush3.bf16.msra.mxu0 %v4301_v39  ;;  %v623_v39 = vmax.f32 %v622_v37, 0.0  ;;  %v4096_v37 = vld [vmem:[#allocation4 + $0x1a8] sm:$0xff]  }
 0x292   :  { %3789 = vmatprep.subr.bf16.mxu0 %v4227_v36 }
 0x295   :  { %3790 = vmatpush3.bf16.msra.mxu0 %v4305_v40  ;;  %v4077_v40 = vld [vmem:[#allocation4 + $0x110] sm:$0xff]  }
 0x296   :  { %3791 = vmatprep.subr.bf16.mxu0 %v4227_v36  ;;  %3426 = vmatpush3.bf16.msra.mxu1 %v4077_v40  ;;  %v4098_v40 = vld [vmem:[#allocation4 + $0x1b8] sm:$0xff]  }
 0x297   :  { %3427 = vmatprep.subr.bf16.mxu1 %v4227_v36 }
 0x299   :  { %3792 = vmatpush3.bf16.msra.mxu0 %v4309_v41  ;;  %v4736_v41 = vpack.c.bf16 %v623_v39, %v623_v39 }
 0x29a   :  { %3793 = vmatprep.subr.bf16.mxu0 %v4227_v36 }
 0x29d   :  { %3794 = vmatpush3.bf16.msra.mxu0 %v4314_v42  ;;  %v4078_v42 = vld [vmem:[#allocation4 + $0x118] sm:$0xff]  }
 0x29e   :  { %3795 = vmatprep.subr.bf16.mxu0 %v4227_v36  ;;  %3428 = vmatpush3.bf16.msra.mxu1 %v4078_v42 }
 0x29f   :  { %3429 = vmatprep.subr.bf16.mxu1 %v4227_v36 }
 0x2a1   :  { %3796 = vmatpush3.bf16.msra.mxu0 %v4319_v43  ;;  %v4079_v43 = vld [vmem:[#allocation4 + $0x120] sm:$0xff]  }
 0x2a2   :  { %3801 = vmatprep.subr.bf16.mxu0 %v4227_v36  ;;  %3430 = vmatpush3.bf16.msra.mxu1 %v4079_v43 }
 0x2a3   :  { %3431 = vmatprep.subr.bf16.mxu1 %v4227_v36 }
 0x2a4   :  { %3798 = vmatmul.mubr.bf16.vlgmr.msra.gmra.mrb[24].mxu0 %v4651_v57 }
 0x2a5   :  { %3802 = vmatpush3.bf16.msra.mxu0 %v4342_v24  ;;  %3817 = vmatprep.mubr.msk.bf16.mxu0 %vm4228_vm0, %v4227_v36  ;;  %v4081_v24 = vld [vmem:[#allocation4 + $0x130] sm:$0xff]  }
 0x2a6   :  { %3803 = vmatprep.subr.bf16.mxu0 %v4227_v36  ;;  %3432 = vmatpush3.bf16.msra.mxu1 %v4080_v18 }
 0x2a7   :  { %3433 = vmatprep.subr.bf16.mxu1 %v4227_v36 }
 0x2a9   :  { %3804 = vmatpush3.bf16.msra.mxu0 %v4352_v28  ;;  %v4082_v28 = vld [vmem:[#allocation4 + $0x138] sm:$0xff]  }
 0x2aa   :  { %3805 = vmatprep.subr.bf16.mxu0 %v4227_v36  ;;  %3434 = vmatpush3.bf16.msra.mxu1 %v4081_v24 }
 0x2ab   :  { %3435 = vmatprep.subr.bf16.mxu1 %v4227_v36 }
 0x2ad   :  { %3806 = vmatpush3.bf16.msra.mxu0 %v4358_v31 }
 0x2ae   :  { %3807 = vmatprep.subr.bf16.mxu0 %v4227_v36  ;;  %3436 = vmatpush3.bf16.msra.mxu1 %v4082_v28 }
 0x2af   :  { %3501 = vmatprep.subr.bf16.mxu1 %v4227_v36 }
 0x2b1   :  { %3808 = vmatpush3.bf16.msra.mxu0 %v4362_v32 }
 0x2b2   :  { %3809 = vmatprep.subr.bf16.mxu0 %v4227_v36 }
 0x2b5   :  { %3810 = vmatpush3.bf16.msra.mxu0 %v4366_v0 }
 0x2b6   :  { %3811 = vmatprep.subr.bf16.mxu0 %v4227_v36 }
 0x2b9   :  { %3812 = vmatpush3.bf16.msra.mxu0 %v4370_v33 }
 0x2ba   :  { %3813 = vmatprep.subr.bf16.mxu0 %v4227_v36 }
 0x2bd   :  { %3814 = vmatpush3.bf16.msra.mxu0 %v4374_v34 }
 0x2be   :  { %3815 = vmatprep.subr.bf16.mxu0 %v4227_v36 }
 0x2c1   :  { %3816 = vmatpush3.bf16.msra.mxu0 %v4379_v45 }
 0x2c2   :  { %3901 = vmatprep.subr.bf16.mxu0 %v4227_v36 }
 0x2c4   :  { %3818 = vmatmul.mubr.bf16.vlgmr.msra.gmra.mrb[24].mxu0 %v4736_v41 }
 0x2c5   :  { %3917 = vmatprep.mubr.msk.bf16.mxu0 %vm4228_vm0, %v4227_v36 }
 0x2d7   :  { %v4749_v63 = vpop.f32.mrb[16].mxu0 }
 0x2d8   :  { %v3579_v3 = vpop.f32.mrb[17].mxu0  ;;  %v3945_v39 = vadd.f32 %v4749_v63, %v4555_v20 }
 0x2d9   :  { %v1600_v4 = vpop.f32.mrb[18].mxu0 }
 0x2da   :  { %v3580_v5 = vpop.f32.mrb[19].mxu0  ;;  %v1604_v42 = vmax.f32 %v3945_v39, 0.0  ;;  %v4166_v39 = vld [vmem:[#allocation4 + $0x18] sm:$0xff]  }
 0x2dc   :  { %v1605_v43 = vpack.c.bf16 %v1604_v42, %v1604_v42  ;;  %v4168_v42 = vld [vmem:[#allocation4 + $0x28] sm:$0xff]  }
 0x337   :  { %v4751_v7 = vpop.f32.mrb[20].mxu0 }
 0x338   :  { %v3739_v8 = vpop.f32.mrb[21].mxu0 }
 0x339   :  { %v2062_v9 = vpop.f32.mrb[22].mxu0 }
 0x33a   :  { %v3740_v10 = vpop.f32.mrb[23].mxu0 }
 0x351   :  { %v1135_v12 = vpop.f32.mrb[12].mxu1 }
 0x352   :  { %v3943_v13 = vadd.f32 %v1135_v12, %v4555_v20  ;;  %v3419_v16 = vpop.f32.mrb[13].mxu1  ;;  %v4107_v12 = vld [vmem:[#allocation4 + $0x200] sm:$0xff]  }
 0x353   :  { %v1138_v6 = vpop.f32.mrb[14].mxu1  ;;  %v4108_v16 = vld [vmem:[#allocation4 + $0x208] sm:$0xff]  }
 0x354   :  { %v1142_v21 = vmax.f32 %v3943_v13, 0.0  ;;  %v3420_v22 = vpop.f32.mrb[15].mxu1  ;;  %v4109_v6 = vld [vmem:[#allocation4 + $0x210] sm:$0xff]  }
 0x355   :  { %v4111_v22 = vld [vmem:[#allocation4 + $0x220] sm:$0xff]  }
 0x356   :  { %v1143_v26 = vpack.c.bf16 %v1142_v21, %v1142_v21  ;;  %v4110_v21 = vld [vmem:[#allocation4 + $0x218] sm:$0xff]  }
 0x358   :  { %3438 = vmatmul.mubr.bf16.vlgmr.msra.gmra.mrb[8].mxu1 %v1143_v26  ;;  %v4113_v26 = vld [vmem:[#allocation4 + $0x230] sm:$0xff]  }
 0x359   :  { %3502 = vmatpush3.bf16.msra.mxu1 %v4083_v23  ;;  %3517 = vmatprep.mubr.msk.bf16.mxu1 %vm4228_vm0, %v4227_v36  ;;  %v4112_v23 = vld [vmem:[#allocation4 + $0x228] sm:$0xff]  }
 0x35a   :  { %3503 = vmatprep.subr.bf16.mxu1 %v4227_v36 }
 0x35d   :  { %3504 = vmatpush3.bf16.msra.mxu1 %v4084_v27  ;;  %v3947_v27 = vadd.f32 %v4751_v7, %v4555_v20  ;;  %v4117_v7 = vld [vmem:[#allocation4 + $0x250] sm:$0xff]  }
 0x35e   :  { %3505 = vmatprep.subr.bf16.mxu1 %v4227_v36 }
 0x361   :  { %3506 = vmatpush3.bf16.msra.mxu1 %v4085_v29  ;;  %v4114_v29 = vld [vmem:[#allocation4 + $0x238] sm:$0xff]  }
 0x362   :  { %3507 = vmatprep.subr.bf16.mxu1 %v4227_v36 }
 0x365   :  { %3508 = vmatpush3.bf16.msra.mxu1 %v4086_v30  ;;  %v2066_v30 = vmax.f32 %v3947_v27, 0.0  ;;  %v4144_v27 = vld [vmem:[#allocation4 + $0x328] sm:$0xff]  }
 0x366   :  { %3509 = vmatprep.subr.bf16.mxu1 %v4227_v36 }
 0x369   :  { %3510 = vmatpush3.bf16.msra.mxu1 %v4087_v17  ;;  %v4115_v17 = vld [vmem:[#allocation4 + $0x240] sm:$0xff]  }
 0x36a   :  { %3511 = vmatprep.subr.bf16.mxu1 %v4227_v36 }
 0x36d   :  { %3512 = vmatpush3.bf16.msra.mxu1 %v4088_v44  ;;  %v2067_v44 = vpack.c.bf16 %v2066_v30, %v2066_v30  ;;  %v4146_v30 = vld [vmem:[#allocation4 + $0x338] sm:$0xff]  }
 0x36e   :  { %3513 = vmatprep.subr.bf16.mxu1 %v4227_v36 }
 0x371   :  { %3514 = vmatpush3.bf16.msra.mxu1 %v4089_v46  ;;  %v4116_v46 = vld [vmem:[#allocation4 + $0x248] sm:$0xff]  }
 0x372   :  { %3515 = vmatprep.subr.bf16.mxu1 %v4227_v36 }
 0x375   :  { %3516 = vmatpush3.bf16.msra.mxu1 %v4090_v56  ;;  %v4119_v56 = vld [vmem:[#allocation4 + $0x260] sm:$0xff]  }
 0x376   :  { %3581 = vmatprep.subr.bf16.mxu1 %v4227_v36 }
 0x378   :  { %3518 = vmatmul.mubr.bf16.vlgmr.msra.gmra.mrb[8].mxu1 %v1374_v60 }
 0x379   :  { %3582 = vmatpush3.bf16.msra.mxu1 %v4091_v25  ;;  %3597 = vmatprep.mubr.msk.bf16.mxu1 %vm4228_vm0, %v4227_v36  ;;  %v4121_v25 = vld [vmem:[#allocation4 + $0x270] sm:$0xff]  }
 0x37a   :  { %3583 = vmatprep.subr.bf16.mxu1 %v4227_v36 }
 0x37d   :  { %3584 = vmatpush3.bf16.msra.mxu1 %v4092_v61  ;;  %v4122_v61 = vld [vmem:[#allocation4 + $0x278] sm:$0xff]  }
 0x37e   :  { %3585 = vmatprep.subr.bf16.mxu1 %v4227_v36 }
 0x381   :  { %3586 = vmatpush3.bf16.msra.mxu1 %v4093_v48 }
 0x382   :  { %3587 = vmatprep.subr.bf16.mxu1 %v4227_v36 }
 0x385   :  { %3588 = vmatpush3.bf16.msra.mxu1 %v4094_v62 }
 0x386   :  { %3589 = vmatprep.subr.bf16.mxu1 %v4227_v36 }
 0x389   :  { %3590 = vmatpush3.bf16.msra.mxu1 %v4095_v1  ;;  %v4163_v1 = vld [vmem:[#allocation4] sm:$0xff]  }
 0x38a   :  { %3591 = vmatprep.subr.bf16.mxu1 %v4227_v36 }
 0x38d   :  { %3592 = vmatpush3.bf16.msra.mxu1 %v4096_v37  ;;  %v4164_v37 = vld [vmem:[#allocation4 + $0x8] sm:$0xff]  }
 0x38e   :  { %3593 = vmatprep.subr.bf16.mxu1 %v4227_v36 }
 0x391   :  { %3594 = vmatpush3.bf16.msra.mxu1 %v4097_v38  ;;  %v4165_v38 = vld [vmem:[#allocation4 + $0x10] sm:$0xff]  }
 0x392   :  { %3595 = vmatprep.subr.bf16.mxu1 %v4227_v36 }
 0x395   :  { %3596 = vmatpush3.bf16.msra.mxu1 %v4098_v40  ;;  %v4167_v40 = vld [vmem:[#allocation4 + $0x20] sm:$0xff]  }
 0x396   :  { %3601 = vmatprep.subr.bf16.mxu1 %v4227_v36 }
 0x397   :  { %v4778_v18 = vpop.f32.mrb[24].mxu0 }
 0x398   :  { %3598 = vmatmul.mubr.bf16.vlgmr.msra.gmra.mrb[8].mxu1 %v1605_v43  ;;  %v3819_v24 = vpop.f32.mrb[25].mxu0  ;;  %v3948_v60 = vadd.f32 %v4778_v18, %v4555_v20  ;;  %v4169_v43 = vld [vmem:[#allocation4 + $0x30] sm:$0xff]   ;;  %v4170_v18 = vld [vmem:[#allocation4 + $0x38] sm:$0xff]  }
 0x399   :  { %3602 = vmatpush3.bf16.msra.mxu1 %v4383_v47  ;;  %v2293_v28 = vpop.f32.mrb[26].mxu0  ;;  %3617 = vmatprep.mubr.msk.bf16.mxu1 %vm4228_vm0, %v4227_v36  ;;  %v4803_v47 = vld [vmem:[#allocation4 + $0x48] sm:$0xff]   ;;  %v4125_v24 = vld [vmem:[#allocation4 + $0x290] sm:$0xff]  }
 0x39a   :  { %3603 = vmatprep.subr.bf16.mxu1 %v4227_v36  ;;  %v3820_v63 = vpop.f32.mrb[27].mxu0  ;;  %v2297_v48 = vmax.f32 %v3948_v60, 0.0  ;;  %v4126_v28 = vld [vmem:[#allocation4 + $0x298] sm:$0xff]  }
 0x39b   :  { %v4127_v63 = vld [vmem:[#allocation4 + $0x2a0] sm:$0xff]  }
 0x39c   :  { %v2298_v62 = vpack.c.bf16 %v2297_v48, %v2297_v48  ;;  %v2818_v48 = vand.u32 127, %v597_v14 }
 0x39d   :  { %3604 = vmatpush3.bf16.msra.mxu1 %v4390_v49  ;;  %v4807_v49 = vld [vmem:[#allocation4 + $0x50] sm:$0xff]  }
 0x39e   :  { %3605 = vmatprep.subr.bf16.mxu1 %v4227_v36  ;;  %vm2819_vm1 = vcmp.lt.s32.totalorder %v2818_v48, 64  ;;  %vm2834_vm3 = vcmp.eq.s32.totalorder %v2818_v48, 64 }
 0x3a1   :  { %3606 = vmatpush3.bf16.msra.mxu1 %v4396_v50  ;;  %v4811_v50 = vld [vmem:[#allocation4 + $0x58] sm:$0xff]  }
 0x3a2   :  { %3607 = vmatprep.subr.bf16.mxu1 %v4227_v36 }
 0x3a5   :  { %3608 = vmatpush3.bf16.msra.mxu1 %v4400_v51  ;;  %v4815_v51 = vld [vmem:[#allocation4 + $0x60] sm:$0xff]  }
 0x3a6   :  { %3609 = vmatprep.subr.bf16.mxu1 %v4227_v36 }
 0x3a9   :  { %3610 = vmatpush3.bf16.msra.mxu1 %v4404_v52  ;;  %v4819_v52 = vld [vmem:[#allocation4 + $0x68] sm:$0xff]  }
 0x3aa   :  { %3611 = vmatprep.subr.bf16.mxu1 %v4227_v36 }
 0x3ad   :  { %3612 = vmatpush3.bf16.msra.mxu1 %v4410_v54  ;;  %v4823_v54 = vld [vmem:[#allocation4 + $0x70] sm:$0xff]  }
 0x3ae   :  { %3613 = vmatprep.subr.bf16.mxu1 %v4227_v36 }
 0x3b1   :  { %3614 = vmatpush3.bf16.msra.mxu1 %v4416_v58  ;;  %v4827_v58 = vld [vmem:[#allocation4 + $0x78] sm:$0xff]  }
 0x3b2   :  { %3615 = vmatprep.subr.bf16.mxu1 %v4227_v36 }
 0x3b5   :  { %3616 = vmatpush3.bf16.msra.mxu1 %v4420_v59  ;;  %v4161_v59 = vld [vmem:[#allocation4 + $0x80] sm:$0xff]  }
 0x3b6   :  { %3621 = vmatprep.subr.bf16.mxu1 %v4227_v36 }
 0x3b8   :  { %3618 = vmatmul.mubr.bf16.vlgmr.msra.gmra.mrb[16].mxu1 %v4475_v11  ;;  %v4162_v11 = vld [vmem:[#allocation4 + $0x88] sm:$0xff]  }
 0x3b9   :  { %3622 = vmatpush3.bf16.msra.mxu1 %v4696_v2  ;;  %3637 = vmatprep.mubr.msk.bf16.mxu1 %vm4228_vm0, %v4227_v36 }
 0x3ba   :  { %3623 = vmatprep.subr.bf16.mxu1 %v4227_v36 }
 0x3bd   :  { %3624 = vmatpush3.bf16.msra.mxu1 %v4803_v47 }
 0x3be   :  { %3625 = vmatprep.subr.bf16.mxu1 %v4227_v36 }
 0x3c1   :  { %3626 = vmatpush3.bf16.msra.mxu1 %v4807_v49 }
 0x3c2   :  { %3627 = vmatprep.subr.bf16.mxu1 %v4227_v36 }
 0x3c5   :  { %3628 = vmatpush3.bf16.msra.mxu1 %v4811_v50 }
 0x3c6   :  { %3629 = vmatprep.subr.bf16.mxu1 %v4227_v36 }
 0x3c9   :  { %3630 = vmatpush3.bf16.msra.mxu1 %v4815_v51 }
 0x3ca   :  { %3631 = vmatprep.subr.bf16.mxu1 %v4227_v36 }
 0x3cd   :  { %3632 = vmatpush3.bf16.msra.mxu1 %v4819_v52 }
 0x3ce   :  { %3633 = vmatprep.subr.bf16.mxu1 %v4227_v36 }
 0x3d1   :  { %3634 = vmatpush3.bf16.msra.mxu1 %v4823_v54 }
 0x3d2   :  { %3635 = vmatprep.subr.bf16.mxu1 %v4227_v36 }
 0x3d5   :  { %3636 = vmatpush3.bf16.msra.mxu1 %v4827_v58 }
 0x3d6   :  { %3641 = vmatprep.subr.bf16.mxu1 %v4227_v36 }
 0x3d8   :  { %3638 = vmatmul.mubr.bf16.vlgmr.msra.gmra.mrb[16].mxu1 %v4539_v19  ;;  %v4105_v19 = vld [vmem:[#allocation4 + $0x1f0] sm:$0xff]  }
 0x3d9   :  { %3642 = vmatpush3.bf16.msra.mxu1 %v4161_v59  ;;  %3657 = vmatprep.mubr.msk.bf16.mxu1 %vm4228_vm0, %v4227_v36  ;;  %v4136_v59 = vld [vmem:[#allocation4 + $0x2e8] sm:$0xff]  }
 0x3da   :  { %3643 = vmatprep.subr.bf16.mxu1 %v4227_v36 }
 0x3dd   :  { %3644 = vmatpush3.bf16.msra.mxu1 %v4162_v11 }
 0x3de   :  { %3645 = vmatprep.subr.bf16.mxu1 %v4227_v36 }
 0x3e1   :  { %3646 = vmatpush3.bf16.msra.mxu1 %v4358_v31  ;;  %v4099_v31 = vld [vmem:[#allocation4 + $0x1c0] sm:$0xff]  }
 0x3e2   :  { %3647 = vmatprep.subr.bf16.mxu1 %v4227_v36 }
 0x3e5   :  { %3648 = vmatpush3.bf16.msra.mxu1 %v4362_v32  ;;  %v4100_v32 = vld [vmem:[#allocation4 + $0x1c8] sm:$0xff]  }
 0x3e6   :  { %3649 = vmatprep.subr.bf16.mxu1 %v4227_v36 }
 0x3e9   :  { %3650 = vmatpush3.bf16.msra.mxu1 %v4366_v0  ;;  %v4101_v0 = vld [vmem:[#allocation4 + $0x1d0] sm:$0xff]  }
 0x3ea   :  { %3651 = vmatprep.subr.bf16.mxu1 %v4227_v36 }
 0x3ed   :  { %3652 = vmatpush3.bf16.msra.mxu1 %v4370_v33  ;;  %v4102_v33 = vld [vmem:[#allocation4 + $0x1d8] sm:$0xff]  }
 0x3ee   :  { %3653 = vmatprep.subr.bf16.mxu1 %v4227_v36 }
 0x3f1   :  { %3654 = vmatpush3.bf16.msra.mxu1 %v4374_v34  ;;  %v4103_v34 = vld [vmem:[#allocation4 + $0x1e0] sm:$0xff]  }
 0x3f2   :  { %3655 = vmatprep.subr.bf16.mxu1 %v4227_v36 }
 0x3f5   :  { %3656 = vmatpush3.bf16.msra.mxu1 %v4379_v45  ;;  %v4104_v45 = vld [vmem:[#allocation4 + $0x1e8] sm:$0xff]  }
 0x3f6   :  { %3661 = vmatprep.subr.bf16.mxu1 %v4227_v36 }
 0x3f8   :  { %3658 = vmatmul.mubr.bf16.vlgmr.msra.gmra.mrb[16].mxu1 %v4611_v55  ;;  %v4106_v55 = vld [vmem:[#allocation4 + $0x1f8] sm:$0xff]  }
 0x3f9   :  { %3662 = vmatpush3.bf16.msra.mxu1 %v4099_v31  ;;  %3677 = vmatprep.mubr.msk.bf16.mxu1 %vm4228_vm0, %v4227_v36 }
 0x3fa   :  { %3663 = vmatprep.subr.bf16.mxu1 %v4227_v36 }
 0x3fd   :  { %3664 = vmatpush3.bf16.msra.mxu1 %v4100_v32 }
 0x3fe   :  { %3665 = vmatprep.subr.bf16.mxu1 %v4227_v36 }
 0x401   :  { %3666 = vmatpush3.bf16.msra.mxu1 %v4101_v0 }
 0x402   :  { %3667 = vmatprep.subr.bf16.mxu1 %v4227_v36 }
 0x405   :  { %3668 = vmatpush3.bf16.msra.mxu1 %v4102_v33 }
 0x406   :  { %3669 = vmatprep.subr.bf16.mxu1 %v4227_v36 }
 0x409   :  { %3670 = vmatpush3.bf16.msra.mxu1 %v4103_v34 }
 0x40a   :  { %3671 = vmatprep.subr.bf16.mxu1 %v4227_v36 }
 0x40d   :  { %3672 = vmatpush3.bf16.msra.mxu1 %v4104_v45 }
 0x40e   :  { %3673 = vmatprep.subr.bf16.mxu1 %v4227_v36 }
 0x411   :  { %3674 = vmatpush3.bf16.msra.mxu1 %v4105_v19  ;;  %v4137_v19 = vld [vmem:[#allocation4 + $0x2f0] sm:$0xff]  }
 0x412   :  { %3675 = vmatprep.subr.bf16.mxu1 %v4227_v36 }
 0x415   :  { %3676 = vmatpush3.bf16.msra.mxu1 %v4106_v55  ;;  %v4138_v55 = vld [vmem:[#allocation4 + $0x2f8] sm:$0xff]  }
 0x416   :  { %3741 = vmatprep.subr.bf16.mxu1 %v4227_v36 }
 0x4cb   :  { %v1828_v3 = vpop.f32.mrb[16].mxu1 }
 0x4cc   :  { %v3946_v4 = vadd.f32 %v1828_v3, %v4555_v20  ;;  %v3659_v5 = vpop.f32.mrb[17].mxu1  ;;  %v677_v3 = vsub.s32 2, %v4330_v15 }
 0x4cd   :  { %v1831_v8 = vpop.f32.mrb[18].mxu1 }
 0x4ce   :  { %v1835_v9 = vmax.f32 %v3946_v4, 0.0  ;;  %v3660_v10 = vpop.f32.mrb[19].mxu1 }
 0x4d0   :  { %v1836_v13 = vpack.c.bf16 %v1835_v9, %v1835_v9 }
 0x4d2   :  { %3678 = vmatmul.mubr.bf16.vlgmr.msra.gmra.mrb[8].mxu1 %v1836_v13 }
 0x4d3   :  { %3742 = vmatpush3.bf16.msra.mxu1 %v4107_v12  ;;  %3757 = vmatprep.mubr.msk.bf16.mxu1 %vm4228_vm0, %v4227_v36 }
 0x4d4   :  { %3743 = vmatprep.subr.bf16.mxu1 %v4227_v36 }
 0x4d7   :  { %3744 = vmatpush3.bf16.msra.mxu1 %v4108_v16  ;;  %v4139_v16 = vld [vmem:[#allocation4 + $0x300] sm:$0xff]  }
 0x4d8   :  { %3745 = vmatprep.subr.bf16.mxu1 %v4227_v36 }
 0x4db   :  { %3746 = vmatpush3.bf16.msra.mxu1 %v4109_v6 }
 0x4dc   :  { %3747 = vmatprep.subr.bf16.mxu1 %v4227_v36 }
 0x4df   :  { %3748 = vmatpush3.bf16.msra.mxu1 %v4110_v21  ;;  %v4140_v21 = vld [vmem:[#allocation4 + $0x308] sm:$0xff]  }
 0x4e0   :  { %3749 = vmatprep.subr.bf16.mxu1 %v4227_v36 }
 0x4e3   :  { %3750 = vmatpush3.bf16.msra.mxu1 %v4111_v22  ;;  %v4141_v22 = vld [vmem:[#allocation4 + $0x310] sm:$0xff]  }
 0x4e4   :  { %3751 = vmatprep.subr.bf16.mxu1 %v4227_v36 }
 0x4e7   :  { %3752 = vmatpush3.bf16.msra.mxu1 %v4112_v23  ;;  %v4142_v23 = vld [vmem:[#allocation4 + $0x318] sm:$0xff]  }
 0x4e8   :  { %3753 = vmatprep.subr.bf16.mxu1 %v4227_v36 }
 0x4eb   :  { %3754 = vmatpush3.bf16.msra.mxu1 %v4113_v26  ;;  %v4143_v26 = vld [vmem:[#allocation4 + $0x320] sm:$0xff]  }
 0x4ec   :  { %3755 = vmatprep.subr.bf16.mxu1 %v4227_v36 }
 0x4ef   :  { %3756 = vmatpush3.bf16.msra.mxu1 %v4114_v29  ;;  %v4145_v29 = vld [vmem:[#allocation4 + $0x330] sm:$0xff]  }
 0x4f0   :  { %3821 = vmatprep.subr.bf16.mxu1 %v4227_v36 }
 0x4f2   :  { %3758 = vmatmul.mubr.bf16.vlgmr.msra.gmra.mrb[8].mxu1 %v2067_v44 }
 0x4f3   :  { %3822 = vmatpush3.bf16.msra.mxu1 %v4115_v17  ;;  %3837 = vmatprep.mubr.msk.bf16.mxu1 %vm4228_vm0, %v4227_v36  ;;  %v2616_v17 = vsub.s32 3, %v4330_v15 }
 0x4f4   :  { %3823 = vmatprep.subr.bf16.mxu1 %v4227_v36 }
 0x4f7   :  { %3824 = vmatpush3.bf16.msra.mxu1 %v4116_v46 }
 0x4f8   :  { %3825 = vmatprep.subr.bf16.mxu1 %v4227_v36 }
 0x4fb   :  { %3826 = vmatpush3.bf16.msra.mxu1 %v4117_v7 }
 0x4fc   :  { %3827 = vmatprep.subr.bf16.mxu1 %v4227_v36 }
 0x4ff   :  { %3828 = vmatpush3.bf16.msra.mxu1 %v4118_v53 }
 0x500   :  { %3829 = vmatprep.subr.bf16.mxu1 %v4227_v36 }
 0x503   :  { %3830 = vmatpush3.bf16.msra.mxu1 %v4119_v56 }
 0x504   :  { %3831 = vmatprep.subr.bf16.mxu1 %v4227_v36 }
 0x507   :  { %3832 = vmatpush3.bf16.msra.mxu1 %v4120_v35 }
 0x508   :  { %3833 = vmatprep.subr.bf16.mxu1 %v4227_v36 }
 0x50b   :  { %3834 = vmatpush3.bf16.msra.mxu1 %v4121_v25 }
 0x50c   :  { %3835 = vmatprep.subr.bf16.mxu1 %v4227_v36 }
 0x50f   :  { %3836 = vmatpush3.bf16.msra.mxu1 %v4122_v61  ;;  %v2727_v61 = vsub.s32 4, %v4330_v15 }
 0x510   :  { %3841 = vmatprep.subr.bf16.mxu1 %v4227_v36 }
 0x512   :  { %3838 = vmatmul.mubr.bf16.vlgmr.msra.gmra.mrb[8].mxu1 %v2298_v62 }
 0x513   :  { %3842 = vmatpush3.bf16.msra.mxu1 %v4163_v1  ;;  %3857 = vmatprep.mubr.msk.bf16.mxu1 %vm4228_vm0, %v4227_v36 }
 0x514   :  { %3843 = vmatprep.subr.bf16.mxu1 %v4227_v36 }
 0x517   :  { %3844 = vmatpush3.bf16.msra.mxu1 %v4164_v37 }
 0x518   :  { %3845 = vmatprep.subr.bf16.mxu1 %v4227_v36 }
 0x51b   :  { %3846 = vmatpush3.bf16.msra.mxu1 %v4165_v38 }
 0x51c   :  { %3847 = vmatprep.subr.bf16.mxu1 %v4227_v36 }
 0x51f   :  { %3848 = vmatpush3.bf16.msra.mxu1 %v4166_v39 }
 0x520   :  { %3849 = vmatprep.subr.bf16.mxu1 %v4227_v36 }
 0x523   :  { %3850 = vmatpush3.bf16.msra.mxu1 %v4167_v40 }
 0x524   :  { %3851 = vmatprep.subr.bf16.mxu1 %v4227_v36 }
 0x527   :  { %3852 = vmatpush3.bf16.msra.mxu1 %v4168_v42 }
 0x528   :  { %3853 = vmatprep.subr.bf16.mxu1 %v4227_v36 }
 0x52b   :  { %3854 = vmatpush3.bf16.msra.mxu1 %v4169_v43 }
 0x52c   :  { %3855 = vmatprep.subr.bf16.mxu1 %v4227_v36 }
 0x52f   :  { %3856 = vmatpush3.bf16.msra.mxu1 %v4170_v18 }
 0x530   :  { %3861 = vmatprep.subr.bf16.mxu1 %v4227_v36 }
 0x532   :  { %3858 = vmatmul.mubr.bf16.vlgmr.msra.gmra.mrb[20].mxu1 %v4651_v57  ;;  %v4123_v57 = vld [vmem:[#allocation4 + $0x280] sm:$0xff]  }
 0x533   :  { %3862 = vmatpush3.bf16.msra.mxu1 %v4696_v2  ;;  %3877 = vmatprep.mubr.msk.bf16.mxu1 %vm4228_vm0, %v4227_v36  ;;  %v4124_v2 = vld [vmem:[#allocation4 + $0x288] sm:$0xff]  }
 0x534   :  { %3863 = vmatprep.subr.bf16.mxu1 %v4227_v36 }
 0x537   :  { %3864 = vmatpush3.bf16.msra.mxu1 %v4803_v47  ;;  %v4129_v47 = vld [vmem:[#allocation4 + $0x2b0] sm:$0xff]  }
 0x538   :  { %3865 = vmatprep.subr.bf16.mxu1 %v4227_v36 }
 0x53b   :  { %3866 = vmatpush3.bf16.msra.mxu1 %v4807_v49  ;;  %v4130_v49 = vld [vmem:[#allocation4 + $0x2b8] sm:$0xff]  }
 0x53c   :  { %3867 = vmatprep.subr.bf16.mxu1 %v4227_v36 }
 0x53f   :  { %3868 = vmatpush3.bf16.msra.mxu1 %v4811_v50  ;;  %v4131_v50 = vld [vmem:[#allocation4 + $0x2c0] sm:$0xff]  }
 0x540   :  { %3869 = vmatprep.subr.bf16.mxu1 %v4227_v36  ;;  %3902 = vmatpush3.bf16.msra.mxu0 %v4131_v50 }
 0x541   :  { %3903 = vmatprep.subr.bf16.mxu0 %v4227_v36 }
 0x543   :  { %3870 = vmatpush3.bf16.msra.mxu1 %v4815_v51  ;;  %v4132_v51 = vld [vmem:[#allocation4 + $0x2c8] sm:$0xff]  }
 0x544   :  { %3871 = vmatprep.subr.bf16.mxu1 %v4227_v36  ;;  %3904 = vmatpush3.bf16.msra.mxu0 %v4132_v51 }
 0x545   :  { %3905 = vmatprep.subr.bf16.mxu0 %v4227_v36 }
 0x547   :  { %3872 = vmatpush3.bf16.msra.mxu1 %v4819_v52  ;;  %v4133_v52 = vld [vmem:[#allocation4 + $0x2d0] sm:$0xff]  }
 0x548   :  { %3873 = vmatprep.subr.bf16.mxu1 %v4227_v36  ;;  %3906 = vmatpush3.bf16.msra.mxu0 %v4133_v52 }
 0x549   :  { %3907 = vmatprep.subr.bf16.mxu0 %v4227_v36 }
 0x54b   :  { %3874 = vmatpush3.bf16.msra.mxu1 %v4823_v54  ;;  %v4134_v54 = vld [vmem:[#allocation4 + $0x2d8] sm:$0xff]  }
 0x54c   :  { %3875 = vmatprep.subr.bf16.mxu1 %v4227_v36  ;;  %3908 = vmatpush3.bf16.msra.mxu0 %v4134_v54 }
 0x54d   :  { %3909 = vmatprep.subr.bf16.mxu0 %v4227_v36 }
 0x54f   :  { %3876 = vmatpush3.bf16.msra.mxu1 %v4827_v58  ;;  %v4135_v58 = vld [vmem:[#allocation4 + $0x2e0] sm:$0xff]  }
 0x550   :  { %3881 = vmatprep.subr.bf16.mxu1 %v4227_v36  ;;  %3910 = vmatpush3.bf16.msra.mxu0 %v4135_v58 }
 0x551   :  { %3911 = vmatprep.subr.bf16.mxu0 %v4227_v36 }
 0x552   :  { %3878 = vmatmul.mubr.bf16.vlgmr.msra.gmra.mrb[20].mxu1 %v4736_v41  ;;  %v4128_v41 = vld [vmem:[#allocation4 + $0x2a8] sm:$0xff]  }
 0x553   :  { %3882 = vmatpush3.bf16.msra.mxu1 %v4123_v57  ;;  %3897 = vmatprep.mubr.msk.bf16.mxu1 %vm4228_vm0, %v4227_v36 }
 0x554   :  { %3883 = vmatprep.subr.bf16.mxu1 %v4227_v36  ;;  %3912 = vmatpush3.bf16.msra.mxu0 %v4136_v59 }
 0x555   :  { %3913 = vmatprep.subr.bf16.mxu0 %v4227_v36 }
 0x557   :  { %3884 = vmatpush3.bf16.msra.mxu1 %v4124_v2 }
 0x558   :  { %3885 = vmatprep.subr.bf16.mxu1 %v4227_v36  ;;  %3914 = vmatpush3.bf16.msra.mxu0 %v4137_v19 }
 0x559   :  { %3915 = vmatprep.subr.bf16.mxu0 %v4227_v36 }
 0x55b   :  { %3886 = vmatpush3.bf16.msra.mxu1 %v4125_v24 }
 0x55c   :  { %3887 = vmatprep.subr.bf16.mxu1 %v4227_v36  ;;  %3916 = vmatpush3.bf16.msra.mxu0 %v4138_v55 }
 0x55d   :  { %3921 = vmatprep.subr.bf16.mxu0 %v4227_v36 }
 0x55f   :  { %3888 = vmatpush3.bf16.msra.mxu1 %v4126_v28 }
 0x560   :  { %3889 = vmatprep.subr.bf16.mxu1 %v4227_v36 }
 0x563   :  { %3890 = vmatpush3.bf16.msra.mxu1 %v4127_v63 }
 0x564   :  { %3891 = vmatprep.subr.bf16.mxu1 %v4227_v36 }
 0x567   :  { %3892 = vmatpush3.bf16.msra.mxu1 %v4128_v41 }
 0x568   :  { %3893 = vmatprep.subr.bf16.mxu1 %v4227_v36 }
 0x56b   :  { %3894 = vmatpush3.bf16.msra.mxu1 %v4129_v47 }
 0x56c   :  { %3895 = vmatprep.subr.bf16.mxu1 %v4227_v36 }
 0x56f   :  { %3896 = vmatpush3.bf16.msra.mxu1 %v4130_v49 }
 0x625   :  { %v2480_v11 = vpop.f32.mrb[20].mxu1 }
 0x626   :  { %v3949_v31 = vadd.f32 %v2480_v11, %v4555_v20  ;;  %v3879_v32 = vpop.f32.mrb[21].mxu1  ;;  %v4171_v20 = vld [vmem:[%s4958_s3] sm:$0xff] }
 0x627   :  { %v2483_v0 = vpop.f32.mrb[22].mxu1  ;;  %v678_v4 = vrot.slane %v4171_v20, %v677_v3  ;;  %v2617_v44 = vrot.slane %v4171_v20, %v2616_v17  ;;  %v2728_v62 = vrot.slane %v4171_v20, %v2727_v61 }
 0x628   :  { %v2487_v33 = vmax.f32 %v3949_v31, 0.0  ;;  %v3880_v34 = vpop.f32.mrb[23].mxu1 }
 0x62a   :  { %v2488_v45 = vpack.c.bf16 %v2487_v33, %v2487_v33 }
 0x62c   :  { %3898 = vmatmul.mubr.bf16.vlgmr.msra.gmra.mrb[8].mxu1 %v2488_v45 }
 0x6ff   :  { %v2588_v5 = vpop.f32.mrb[8].mxu1 }
 0x700   :  { %v3942_v8 = vadd.f32 %v2588_v5, %v678_v4  ;;  %v3899_v9 = vpop.f32.mrb[9].mxu1 }
 0x701   :  { %v2591_v10 = vpop.f32.mrb[10].mxu1 }
 0x702   :  { %v2595_v12 = vmax.f32 %v3942_v8, 0.0  ;;  %v3900_v13 = vpop.f32.mrb[11].mxu1 }
 0x704   :  { %v2596_v6 = vpack.c.bf16 %v2595_v12, %v2595_v12 }
 0x706   :  { %3918 = vmatmul.mubr.bf16.vlgmr.msra.gmra.mrb[28].mxu0 %v2596_v6 }
 0x707   :  { %3922 = vmatpush3.bf16.msra.mxu0 %v4139_v16  ;;  %3937 = vmatprep.mubr.msk.bf16.mxu0 %vm4228_vm0, %v4227_v36 }
 0x708   :  { %3923 = vmatprep.subr.bf16.mxu0 %v4227_v36 }
 0x70b   :  { %3924 = vmatpush3.bf16.msra.mxu0 %v4140_v21 }
 0x70c   :  { %3925 = vmatprep.subr.bf16.mxu0 %v4227_v36 }
 0x70f   :  { %3926 = vmatpush3.bf16.msra.mxu0 %v4141_v22 }
 0x710   :  { %3927 = vmatprep.subr.bf16.mxu0 %v4227_v36 }
 0x713   :  { %3928 = vmatpush3.bf16.msra.mxu0 %v4142_v23 }
 0x714   :  { %3929 = vmatprep.subr.bf16.mxu0 %v4227_v36 }
 0x717   :  { %3930 = vmatpush3.bf16.msra.mxu0 %v4143_v26 }
 0x718   :  { %3931 = vmatprep.subr.bf16.mxu0 %v4227_v36 }
 0x71b   :  { %3932 = vmatpush3.bf16.msra.mxu0 %v4144_v27 }
 0x71c   :  { %3933 = vmatprep.subr.bf16.mxu0 %v4227_v36 }
 0x71f   :  { %3934 = vmatpush3.bf16.msra.mxu0 %v4145_v29 }
 0x720   :  { %3935 = vmatprep.subr.bf16.mxu0 %v4227_v36 }
 0x723   :  { %3936 = vmatpush3.bf16.msra.mxu0 %v4146_v30 }
 0x7d9   :  { %v2700_v46 = vpop.f32.mrb[28].mxu0 }
 0x7da   :  { %v2701_v7 = vadd.f32 %v2700_v46, %v2617_v44  ;;  %v3919_v53 = vpop.f32.mrb[29].mxu0 }
 0x7db   :  { %v2703_v56 = vpop.f32.mrb[30].mxu0 }
 0x7dc   :  { %v2706_v35 = vmax.f32 %v2701_v7, 0.0  ;;  %v3920_v25 = vpop.f32.mrb[31].mxu0 }
 0x7de   :  { %v2707_v60 = vpack.c.bf16 %v2706_v35, %v2706_v35 }
 0x7e0   :  { %3938 = vmatmul.mubr.bf16.vlgmr.msra.gmra.mrb[32].mxu0 %v2707_v60 }
 0x8b3   :  { %v2811_v1 = vpop.f32.mrb[32].mxu0 }
 0x8b4   :  { %v2812_v36 = vadd.f32 %v2811_v1, %v2728_v62  ;;  %v3939_v37 = vpop.f32.mrb[33].mxu0 }
 0x8b5   :  { %v2814_v38 = vpop.f32.mrb[34].mxu0 }
 0x8b6   :  { %4147 = vtanh.f32 %v2812_v36  ;;  %v3940_v39 = vpop.f32.mrb[35].mxu0  ;;  %v2820_v40 = vsel %vm2819_vm1, %v2812_v36, -1e+30 }
 0x8b7   :  { %v2822_v42 = vsel %vm2821_vm2, %v2820_v40, -inf }
 0x8b8   :  { %2823 = vmax.xlane.f32.xlu0 %v2822_v42 }
 0x8c0   :  { %v4148_v43 = vpop.eup %4147 }
 0x8c1   :  { %v2836_v18 = vsel %vm2834_vm3, %v4148_v43, 0.0 }
 0x945   :  { %v2824_v15 = vpop.xlane.xlu0 %2823 }
 0x946   :  { %v2825_v57 = vsub.f32 %v2820_v40, %v2824_v15 }
 0x948   :  { %v2826_v14 = vmul.f32 1.442695, %v2825_v57 }
 0x94a   :  { %4149 = vpow2.f32 %v2826_v14 }
 0x954   :  { %v4150_v2 = vpop.eup %4149 }
 0x955   :  { %v2828_v24 = vsel %vm2819_vm1, %v4150_v2, 0.0 }
 0x956   :  { %v2829_v28 = vsel %vm2821_vm2, %v2828_v24, 0.0 }
 0x957   :  { %2830 = vadd.xlane.f32.xlu0 %v2829_v28 }
 0x9e4   :  { %v2831_v63 = vpop.xlane.xlu0 %2830 }
 0x9e5   :  { %4151 = vrcp.f32 %v2831_v63 }
 0x9ef   :  { %v4152_v41 = vpop.eup %4151 }
 0x9f0   :  { %v2833_v47 = vmul.f32 %v4152_v41, %v2828_v24 }
 0x9f2   :  { %v2837_v49 = vadd.f32 %v2836_v18, %v2833_v47 }
 0x9f4   :  { %2838 = vst [vmem:[%s4959_s4] sm:$0x3] %v2837_v49 }
 0x9f5   :  { %2843 = vsyncpa [#allocation3], 1 }
 0x9f6   :  { %2844 = vsyncpa [#allocation5], 1 }

</bundles_post_ra>
